<compile_context>
chip_gen: v5e
topology: v5e:2x2
jax: 0.10.0
libtpu: 0.0.40
codegen_flags: <defaults>
</compile_context>

<pallas_src>
import functools

import jax
import jax.numpy as jnp
from jax import lax
from jax.experimental import pallas as pl
from jax.experimental.pallas import tpu as pltpu


def _st_layer_kernel(x_ref, skip_ref, adj_ref,
                     wfg_ref, bfg_ref, wsk_ref, bsk_ref,
                     wfc_ref, al_ref, art_ref, wagg_ref, bagg_ref,
                     scale_ref, shift_ref,
                     x_out_ref, skip_out_ref,
                     *, kernel_size, dilation, n_heads, negative_slope):
    T, N, c_in = x_ref.shape
    t_out = skip_ref.shape[0]
    n_dil = wsk_ref.shape[0]
    out_feats = wagg_ref.shape[0] // n_heads
    rows = t_out * N

    # ---- temporal dilated conv: all nodes/timesteps + filter & gate in ONE matmul ----
    x = x_ref[...]                                                    # (T, N, Cin)
    taps = [x[k * dilation:k * dilation + t_out].reshape(rows, c_in)
            for k in range(kernel_size)]
    x_cat = taps[0] if kernel_size == 1 else jnp.concatenate(taps, axis=-1)
    fg = jnp.dot(x_cat, wfg_ref[...],
                 preferred_element_type=jnp.float32) + bfg_ref[...]   # (rows, 2*n_dil)
    gated = jnp.tanh(fg[:, :n_dil]) * jax.nn.sigmoid(fg[:, n_dil:])   # (rows, n_dil)

    # ---- skip branch: 1x1 conv (single matmul) + skip add ----
    s = jnp.dot(gated, wsk_ref[...],
                preferred_element_type=jnp.float32) + bsk_ref[...]    # (rows, n_skip)
    skip_out_ref[...] = (s + skip_ref[...].reshape(rows, -1)).reshape(skip_out_ref.shape)

    # ---- GAT over the node graph, batched across all t_out timesteps ----
    feat = jnp.dot(gated, wfc_ref[...],
                   preferred_element_type=jnp.float32)                # (rows, H*F)
    feat3 = feat.reshape(t_out, N, n_heads * out_feats)
    adj = adj_ref[...]                                                # (N, N), adj[v,u]=1 iff u->v
    rst_heads = []
    for h in range(n_heads):                                          # tiny static head loop
        lo, hi = h * out_feats, (h + 1) * out_feats
        fh = feat[:, lo:hi]                                           # (rows, F)
        fh3 = feat3[:, :, lo:hi]                                      # (t, N, F)
        # er[t, v] = <feat_v, attn_r> (dest), el[t, u] = <feat_u, attn_l> (source)
        er_col = jnp.dot(fh, art_ref[:, h:h + 1],
                         preferred_element_type=jnp.float32).reshape(t_out, N, 1)
        al_bc = jnp.broadcast_to(al_ref[h:h + 1, :].reshape(1, 1, out_feats),
                                 (t_out, 1, out_feats))
        el_row = lax.dot_general(al_bc, fh3, (((2,), (2,)), ((0,), (0,))),
                                 preferred_element_type=jnp.float32)  # (t, 1, N)
        scores = er_col + el_row                                      # scores[t,v,u] = er[t,v]+el[t,u]
        scores = jnp.where(scores >= 0, scores, negative_slope * scores)   # LeakyReLU
        scores = jnp.where(adj[None, :, :] > 0, scores, -1e30)        # mask non-edges
        m = jnp.max(scores, axis=-1, keepdims=True)
        p = jnp.exp(scores - m)
        attn = p / jnp.sum(p, axis=-1, keepdims=True)                 # edge softmax (incoming)
        rst_heads.append(lax.dot_general(attn, fh3, (((2,), (1,)), ((0,), (0,))),
                                         preferred_element_type=jnp.float32))   # (t, N, F)
    rst = rst_heads[0] if n_heads == 1 else jnp.concatenate(rst_heads, axis=-1)
    rst_flat = rst.reshape(rows, n_heads * out_feats)

    # ---- head-concat Linear + residual add + BatchNorm1d (eval affine) ----
    y = jnp.dot(rst_flat, wagg_ref[...],
                preferred_element_type=jnp.float32) + bagg_ref[...]   # (rows, c_res)
    y = y + x[T - t_out:].reshape(rows, c_in)                         # residual (dropout = identity)
    y = y * scale_ref[...] + shift_ref[...]                           # folded BN (eval)
    x_out_ref[...] = y.reshape(x_out_ref.shape)


def st_layer_forward(x, skip, adj, params, *, kernel_size, dilation, n_heads):
    N, c_res, T = x.shape
    K = kernel_size
    n_dil = params["wf"].shape[2]
    n_skip = params["wsk"].shape[1]
    t_out = T - dilation * (K - 1)
    H = n_heads
    out_feats = c_res                                   # GATConv(n_dilations, n_residuals, H)

    # ---- glue: layout transposes + one-time parameter repacking (pure XLA) ----
    x_t = jnp.transpose(x, (2, 0, 1))                        # (T, N, c_res)
    skip_t = jnp.transpose(skip[:, :, -t_out:], (2, 0, 1))   # (t_out, N, n_skip)

    wfg = jnp.concatenate([params["wf"].reshape(K * c_res, n_dil),
                           params["wg"].reshape(K * c_res, n_dil)], axis=1)  # (K*c_res, 2*n_dil)
    bfg = jnp.concatenate([params["bf"], params["bg"]], axis=1)              # (1, 2*n_dil)
    art = jnp.transpose(params["attn_r"], (1, 0))                            # (out_feats, H)

    eps = 1e-5
    inv_std = params["bn_gamma"] / jnp.sqrt(params["bn_var"] + eps)
    scale = inv_std.reshape(1, c_res)
    shift = (params["bn_beta"] - params["bn_mean"] * inv_std).reshape(1, c_res)

    def full(shp):
        return pl.BlockSpec(shp, lambda i: (0,) * len(shp))

    kernel = pl.pallas_call(
        functools.partial(_st_layer_kernel, kernel_size=K, dilation=dilation,
                          n_heads=H, negative_slope=0.2),
        grid=(1,),
        in_specs=[
            full((T, N, c_res)),            # x
            full((t_out, N, n_skip)),       # skip (already sliced to last t_out)
            full((N, N)),                   # adj
            full((K * c_res, 2 * n_dil)),   # fused filter|gate conv weight
            full((1, 2 * n_dil)),           # fused filter|gate bias
            full((n_dil, n_skip)),          # skip_conv weight
            full((1, n_skip)),              # skip_conv bias
            full((n_dil, H * out_feats)),   # GAT fc weight
            full((H, out_feats)),           # attn_l
            full((out_feats, H)),           # attn_r (transposed)
            full((H * out_feats, c_res)),   # agg weight
            full((1, c_res)),               # agg bias
            full((1, c_res)),               # BN scale
            full((1, c_res)),               # BN shift
        ],
        out_specs=[full((t_out, N, c_res)), full((t_out, N, n_skip))],
        out_shape=[jax.ShapeDtypeStruct((t_out, N, c_res), jnp.float32),
                   jax.ShapeDtypeStruct((t_out, N, n_skip), jnp.float32)],
        compiler_params=pltpu.CompilerParams(dimension_semantics=("arbitrary",)),
    )
    out_x, out_skip = kernel(x_t, skip_t, adj, wfg, bfg,
                             params["wsk"], params["bsk"], params["wfc"],
                             params["attn_l"], art, params["wagg"], params["bagg"],
                             scale, shift)

    x_out = jnp.transpose(out_x, (1, 2, 0))        # (N, c_res, t_out)
    skip_out = jnp.transpose(out_skip, (1, 2, 0))  # (N, n_skip, t_out)
    return x_out, skip_out


def init_params(key, *, c_res, n_dil, n_skip, kernel_size, n_heads):
    ks = jax.random.split(key, 12)
    f = lambda k, shape, s=0.1: (s * jax.random.normal(k, shape)).astype(jnp.float32)
    out_feats = c_res
    return dict(
        wf=f(ks[0], (kernel_size, c_res, n_dil)),          # filter_conv weight (tap, Cin, Cout)
        bf=f(ks[1], (1, n_dil)),
        wg=f(ks[2], (kernel_size, c_res, n_dil)),          # gate_conv
        bg=f(ks[3], (1, n_dil)),
        wsk=f(ks[4], (n_dil, n_skip)),                     # skip_conv (1x1) as matmul
        bsk=f(ks[5], (1, n_skip)),
        wfc=f(ks[6], (n_dil, n_heads * out_feats)),        # GATConv.fc (no bias)
        attn_l=f(ks[7], (n_heads, out_feats)),
        attn_r=f(ks[8], (n_heads, out_feats)),
        wagg=f(ks[9], (n_heads * out_feats, c_res)),       # agg Linear
        bagg=f(ks[10], (1, c_res)),
        bn_gamma=jnp.full((c_res,), 1.1, jnp.float32),
        bn_beta=jnp.full((c_res,), 0.05, jnp.float32),
        bn_mean=f(ks[11], (c_res,)),
        bn_var=jnp.full((c_res,), 0.9, jnp.float32),
    )


if __name__ == "__main__":
    N, c_res, n_dil, n_skip = 8, 16, 32, 64      # nodes, n_residuals, n_dilations, n_skip
    kernel_size, dilation, n_heads, T = 2, 2, 2, 13
    t_out = T - dilation * (kernel_size - 1)

    key = jax.random.PRNGKey(0)
    kx, ksk, kp = jax.random.split(key, 3)
    x = jax.random.normal(kx, (N, c_res, T), jnp.float32)
    skip = jax.random.normal(ksk, (N, n_skip, T), jnp.float32)
    # graph: self-loops + directed ring (every node has in-degree >= 1)
    adj = jnp.clip(jnp.eye(N) + jnp.roll(jnp.eye(N), -1, axis=1), 0.0, 1.0).astype(jnp.float32)

    params = init_params(kp, c_res=c_res, n_dil=n_dil, n_skip=n_skip,
                         kernel_size=kernel_size, n_heads=n_heads)

    fwd = jax.jit(functools.partial(st_layer_forward, kernel_size=kernel_size,
                                    dilation=dilation, n_heads=n_heads))
    x_out, skip_out = fwd(x, skip, adj, params)
    jax.block_until_ready((x_out, skip_out))
    assert x_out.shape == (N, c_res, t_out)
    assert skip_out.shape == (N, n_skip, t_out)
    assert bool(jnp.all(jnp.isfinite(x_out))) and bool(jnp.all(jnp.isfinite(skip_out)))
    print("KERNEL_OK")
</pallas_src>

<mosaic_0001>
module attributes {stable_mosaic.version = 11 : i64} {
  func.func @_st_layer_kernel(%arg0: i32, %arg1: memref<13x8x16xf32, #tpu.memory_space<vmem>>, %arg2: memref<11x8x64xf32, #tpu.memory_space<vmem>>, %arg3: memref<8x8xf32, #tpu.memory_space<vmem>>, %arg4: memref<32x64xf32, #tpu.memory_space<vmem>>, %arg5: memref<1x64xf32, #tpu.memory_space<vmem>>, %arg6: memref<32x64xf32, #tpu.memory_space<vmem>>, %arg7: memref<1x64xf32, #tpu.memory_space<vmem>>, %arg8: memref<32x32xf32, #tpu.memory_space<vmem>>, %arg9: memref<2x16xf32, #tpu.memory_space<vmem>>, %arg10: memref<16x2xf32, #tpu.memory_space<vmem>>, %arg11: memref<32x16xf32, #tpu.memory_space<vmem>>, %arg12: memref<1x16xf32, #tpu.memory_space<vmem>>, %arg13: memref<1x16xf32, #tpu.memory_space<vmem>>, %arg14: memref<1x16xf32, #tpu.memory_space<vmem>>, %arg15: memref<11x8x16xf32, #tpu.memory_space<vmem>>, %arg16: memref<11x8x64xf32, #tpu.memory_space<vmem>>) attributes {dimension_semantics = [#tpu.dimension_semantics<arbitrary>], iteration_bounds = array<i64: 1>, scalar_prefetch = 0 : i64, scratch_operands = 0 : i64, tpu.core_type = #tpu.core_type<tc>, window_params = [{pipeline_mode = #tpu.pipeline_mode<synchronous>, transform_indices = @transform_0, window_bounds = array<i64: 13, 8, 16>}, {pipeline_mode = #tpu.pipeline_mode<synchronous>, transform_indices = @transform_1, window_bounds = array<i64: 11, 8, 64>}, {pipeline_mode = #tpu.pipeline_mode<synchronous>, transform_indices = @transform_2, window_bounds = array<i64: 8, 8>}, {pipeline_mode = #tpu.pipeline_mode<synchronous>, transform_indices = @transform_3, window_bounds = array<i64: 32, 64>}, {pipeline_mode = #tpu.pipeline_mode<synchronous>, transform_indices = @transform_4, window_bounds = array<i64: 1, 64>}, {pipeline_mode = #tpu.pipeline_mode<synchronous>, transform_indices = @transform_5, window_bounds = array<i64: 32, 64>}, {pipeline_mode = #tpu.pipeline_mode<synchronous>, transform_indices = @transform_6, window_bounds = array<i64: 1, 64>}, {pipeline_mode = #tpu.pipeline_mode<synchronous>, transform_indices = @transform_7, window_bounds = array<i64: 32, 32>}, {pipeline_mode = #tpu.pipeline_mode<synchronous>, transform_indices = @transform_8, window_bounds = array<i64: 2, 16>}, {pipeline_mode = #tpu.pipeline_mode<synchronous>, transform_indices = @transform_9, window_bounds = array<i64: 16, 2>}, {pipeline_mode = #tpu.pipeline_mode<synchronous>, transform_indices = @transform_10, window_bounds = array<i64: 32, 16>}, {pipeline_mode = #tpu.pipeline_mode<synchronous>, transform_indices = @transform_11, window_bounds = array<i64: 1, 16>}, {pipeline_mode = #tpu.pipeline_mode<synchronous>, transform_indices = @transform_12, window_bounds = array<i64: 1, 16>}, {pipeline_mode = #tpu.pipeline_mode<synchronous>, transform_indices = @transform_13, window_bounds = array<i64: 1, 16>}, {pipeline_mode = #tpu.pipeline_mode<synchronous>, transform_indices = @transform_14, window_bounds = array<i64: 11, 8, 16>}, {pipeline_mode = #tpu.pipeline_mode<synchronous>, transform_indices = @transform_15, window_bounds = array<i64: 11, 8, 64>}]} {
    %c0 = arith.constant 0 : index
    %c0_0 = arith.constant 0 : index
    %c0_1 = arith.constant 0 : index
    %0 = vector.load %arg1[%c0, %c0_0, %c0_1] : memref<13x8x16xf32, #tpu.memory_space<vmem>>, vector<13x8x16xf32>
    %1 = vector.extract_strided_slice %0 {offsets = [0, 0, 0], sizes = [11, 8, 16], strides = [1, 1, 1]} : vector<13x8x16xf32> to vector<11x8x16xf32>
    %2 = vector.shape_cast %1 : vector<11x8x16xf32> to vector<88x16xf32>
    %3 = vector.extract_strided_slice %0 {offsets = [2, 0, 0], sizes = [11, 8, 16], strides = [1, 1, 1]} : vector<13x8x16xf32> to vector<11x8x16xf32>
    %4 = vector.shape_cast %3 : vector<11x8x16xf32> to vector<88x16xf32>
    %5 = tpu.concatenate %2, %4 in 1 : vector<88x16xf32>, vector<88x16xf32> -> vector<88x32xf32>
    %c0_2 = arith.constant 0 : index
    %c0_3 = arith.constant 0 : index
    %6 = vector.load %arg4[%c0_2, %c0_3] : memref<32x64xf32, #tpu.memory_space<vmem>>, vector<32x64xf32>
    %cst = arith.constant dense<0.000000e+00> : vector<88x64xf32>
    %7 = tpu.matmul %5, %6, %cst {dimension_numbers = #tpu.dot_dimension_numbers<[1], [0], [0], [1], [0, 0, 1, 1], [], []>} : vector<88x32xf32>, vector<32x64xf32>, vector<88x64xf32> -> vector<88x64xf32>
    %c0_4 = arith.constant 0 : index
    %c0_5 = arith.constant 0 : index
    %8 = vector.load %arg5[%c0_4, %c0_5] : memref<1x64xf32, #tpu.memory_space<vmem>>, vector<1x64xf32>
    %9 = vector.broadcast %8 : vector<1x64xf32> to vector<88x64xf32>
    %10 = arith.addf %7, %9 : vector<88x64xf32>
    %11 = vector.extract_strided_slice %10 {offsets = [0, 0], sizes = [88, 32], strides = [1, 1]} : vector<88x64xf32> to vector<88x32xf32>
    %12 = math.tanh %11 : vector<88x32xf32>
    %13 = vector.extract_strided_slice %10 {offsets = [0, 32], sizes = [88, 32], strides = [1, 1]} : vector<88x64xf32> to vector<88x32xf32>
    %14 = arith.negf %13 : vector<88x32xf32>
    %15 = math.exp %14 : vector<88x32xf32>
    %cst_6 = arith.constant 1.000000e+00 : f32
    %16 = vector.broadcast %cst_6 : f32 to vector<88x32xf32>
    %17 = arith.addf %16, %15 : vector<88x32xf32>
    %18 = arith.divf %16, %17 : vector<88x32xf32>
    %19 = arith.mulf %12, %18 : vector<88x32xf32>
    %c0_7 = arith.constant 0 : index
    %c0_8 = arith.constant 0 : index
    %20 = vector.load %arg6[%c0_7, %c0_8] : memref<32x64xf32, #tpu.memory_space<vmem>>, vector<32x64xf32>
    %cst_9 = arith.constant dense<0.000000e+00> : vector<88x64xf32>
    %21 = tpu.matmul %19, %20, %cst_9 {dimension_numbers = #tpu.dot_dimension_numbers<[1], [0], [0], [1], [0, 0, 1, 1], [], []>} : vector<88x32xf32>, vector<32x64xf32>, vector<88x64xf32> -> vector<88x64xf32>
    %c0_10 = arith.constant 0 : index
    %c0_11 = arith.constant 0 : index
    %22 = vector.load %arg7[%c0_10, %c0_11] : memref<1x64xf32, #tpu.memory_space<vmem>>, vector<1x64xf32>
    %23 = vector.broadcast %22 : vector<1x64xf32> to vector<88x64xf32>
    %24 = arith.addf %21, %23 : vector<88x64xf32>
    %c0_12 = arith.constant 0 : index
    %c0_13 = arith.constant 0 : index
    %c0_14 = arith.constant 0 : index
    %25 = vector.load %arg2[%c0_12, %c0_13, %c0_14] : memref<11x8x64xf32, #tpu.memory_space<vmem>>, vector<11x8x64xf32>
    %26 = vector.shape_cast %25 : vector<11x8x64xf32> to vector<88x64xf32>
    %27 = arith.addf %24, %26 : vector<88x64xf32>
    %28 = vector.shape_cast %27 : vector<88x64xf32> to vector<11x8x64xf32>
    %c0_15 = arith.constant 0 : index
    %c0_16 = arith.constant 0 : index
    %c0_17 = arith.constant 0 : index
    %29 = vector.load %arg16[%c0_15, %c0_16, %c0_17] : memref<11x8x64xf32, #tpu.memory_space<vmem>>, vector<11x8x64xf32>
    tpu.vector_store %arg16[%c0_15, %c0_16, %c0_17], %28 {strides = array<i32>} : memref<11x8x64xf32, #tpu.memory_space<vmem>>, vector<11x8x64xf32>,
    %c0_18 = arith.constant 0 : index
    %c0_19 = arith.constant 0 : index
    %30 = vector.load %arg8[%c0_18, %c0_19] : memref<32x32xf32, #tpu.memory_space<vmem>>, vector<32x32xf32>
    %cst_20 = arith.constant dense<0.000000e+00> : vector<88x32xf32>
    %31 = tpu.matmul %19, %30, %cst_20 {dimension_numbers = #tpu.dot_dimension_numbers<[1], [0], [0], [1], [0, 0, 1, 1], [], []>} : vector<88x32xf32>, vector<32x32xf32>, vector<88x32xf32> -> vector<88x32xf32>
    %32 = vector.shape_cast %31 : vector<88x32xf32> to vector<11x8x32xf32>
    %c0_21 = arith.constant 0 : index
    %c0_22 = arith.constant 0 : index
    %33 = vector.load %arg3[%c0_21, %c0_22] : memref<8x8xf32, #tpu.memory_space<vmem>>, vector<8x8xf32>
    %34 = vector.extract_strided_slice %31 {offsets = [0, 0], sizes = [88, 16], strides = [1, 1]} : vector<88x32xf32> to vector<88x16xf32>
    %35 = vector.extract_strided_slice %32 {offsets = [0, 0, 0], sizes = [11, 8, 16], strides = [1, 1, 1]} : vector<11x8x32xf32> to vector<11x8x16xf32>
    %c0_23 = arith.constant 0 : index
    %c0_24 = arith.constant 0 : index
    %36 = vector.load %arg10[%c0_23, %c0_24] : memref<16x2xf32, #tpu.memory_space<vmem>>, vector<16x1xf32>
    %cst_25 = arith.constant dense<0.000000e+00> : vector<88x1xf32>
    %37 = tpu.matmul %34, %36, %cst_25 {dimension_numbers = #tpu.dot_dimension_numbers<[1], [0], [0], [1], [0, 0, 1, 1], [], []>} : vector<88x16xf32>, vector<16x1xf32>, vector<88x1xf32> -> vector<88x1xf32>
    %38 = vector.shape_cast %37 : vector<88x1xf32> to vector<11x8x1xf32>
    %c0_26 = arith.constant 0 : index
    %c0_27 = arith.constant 0 : index
    %39 = vector.load %arg9[%c0_26, %c0_27] : memref<2x16xf32, #tpu.memory_space<vmem>>, vector<1x16xf32>
    %40 = vector.shape_cast %39 : vector<1x16xf32> to vector<1x1x16xf32>
    %41 = vector.shape_cast %40 : vector<1x1x16xf32> to vector<1x1x16xf32>
    %42 = vector.broadcast %41 : vector<1x1x16xf32> to vector<11x1x16xf32>
    %cst_28 = arith.constant dense<0.000000e+00> : vector<11x1x8xf32>
    %43 = tpu.matmul %42, %35, %cst_28 {dimension_numbers = #tpu.dot_dimension_numbers<[2], [2], [1], [1], [0, 0, 0, 1, 1, 1], [0], [0]>} : vector<11x1x16xf32>, vector<11x8x16xf32>, vector<11x1x8xf32> -> vector<11x1x8xf32>
    %44 = vector.broadcast %38 : vector<11x8x1xf32> to vector<11x8x8xf32>
    %45 = vector.broadcast %43 : vector<11x1x8xf32> to vector<11x8x8xf32>
    %46 = arith.addf %44, %45 : vector<11x8x8xf32>
    %cst_29 = arith.constant 0.000000e+00 : f32
    %47 = vector.broadcast %cst_29 : f32 to vector<11x8x8xf32>
    %48 = arith.cmpf oge, %46, %47 : vector<11x8x8xf32>
    %cst_30 = arith.constant 2.000000e-01 : f32
    %49 = vector.broadcast %cst_30 : f32 to vector<11x8x8xf32>
    %50 = arith.mulf %49, %46 : vector<11x8x8xf32>
    %51 = arith.select %48, %46, %50 : vector<11x8x8xi1>, vector<11x8x8xf32>
    %52 = vector.shape_cast %33 : vector<8x8xf32> to vector<1x8x8xf32>
    %cst_31 = arith.constant 0.000000e+00 : f32
    %53 = vector.broadcast %cst_31 : f32 to vector<1x8x8xf32>
    %54 = arith.cmpf ogt, %52, %53 : vector<1x8x8xf32>
    %cst_32 = arith.constant -1.000000e+30 : f32
    %55 = vector.shape_cast %54 : vector<1x8x8xi1> to vector<1x8x8xi1>
    %56 = vector.broadcast %55 : vector<1x8x8xi1> to vector<11x8x8xi1>
    %57 = vector.broadcast %cst_32 : f32 to vector<11x8x8xf32>
    %58 = arith.select %56, %51, %57 : vector<11x8x8xi1>, vector<11x8x8xf32>
    %cst_33 = arith.constant dense<0xFF800000> : vector<11x8xf32>
    %59 = vector.multi_reduction <maximumf>, %58, %cst_33 [2] : vector<11x8x8xf32> to vector<11x8xf32>
    %60 = vector.shape_cast %59 : vector<11x8xf32> to vector<11x8x1xf32>
    %61 = vector.broadcast %60 : vector<11x8x1xf32> to vector<11x8x8xf32>
    %62 = arith.subf %58, %61 : vector<11x8x8xf32>
    %63 = math.exp %62 : vector<11x8x8xf32>
    %cst_34 = arith.constant dense<0.000000e+00> : vector<11x8xf32>
    %64 = vector.multi_reduction <add>, %63, %cst_34 [2] : vector<11x8x8xf32> to vector<11x8xf32>
    %65 = vector.shape_cast %64 : vector<11x8xf32> to vector<11x8x1xf32>
    %66 = vector.broadcast %65 : vector<11x8x1xf32> to vector<11x8x8xf32>
    %67 = arith.divf %63, %66 : vector<11x8x8xf32>
    %cst_35 = arith.constant dense<0.000000e+00> : vector<11x8x16xf32>
    %68 = tpu.matmul %67, %35, %cst_35 {dimension_numbers = #tpu.dot_dimension_numbers<[2], [1], [1], [2], [0, 0, 0, 1, 1, 2], [0], [0]>} : vector<11x8x8xf32>, vector<11x8x16xf32>, vector<11x8x16xf32> -> vector<11x8x16xf32>
    %69 = vector.extract_strided_slice %31 {offsets = [0, 16], sizes = [88, 16], strides = [1, 1]} : vector<88x32xf32> to vector<88x16xf32>
    %70 = vector.extract_strided_slice %32 {offsets = [0, 0, 16], sizes = [11, 8, 16], strides = [1, 1, 1]} : vector<11x8x32xf32> to vector<11x8x16xf32>
    %c0_36 = arith.constant 0 : index
    %c1 = arith.constant 1 : index
    %71 = vector.load %arg10[%c0_36, %c1] : memref<16x2xf32, #tpu.memory_space<vmem>>, vector<16x1xf32>
    %cst_37 = arith.constant dense<0.000000e+00> : vector<88x1xf32>
    %72 = tpu.matmul %69, %71, %cst_37 {dimension_numbers = #tpu.dot_dimension_numbers<[1], [0], [0], [1], [0, 0, 1, 1], [], []>} : vector<88x16xf32>, vector<16x1xf32>, vector<88x1xf32> -> vector<88x1xf32>
    %73 = vector.shape_cast %72 : vector<88x1xf32> to vector<11x8x1xf32>
    %c1_38 = arith.constant 1 : index
    %c0_39 = arith.constant 0 : index
    %74 = vector.load %arg9[%c1_38, %c0_39] : memref<2x16xf32, #tpu.memory_space<vmem>>, vector<1x16xf32>
    %75 = vector.shape_cast %74 : vector<1x16xf32> to vector<1x1x16xf32>
    %76 = vector.shape_cast %75 : vector<1x1x16xf32> to vector<1x1x16xf32>
    %77 = vector.broadcast %76 : vector<1x1x16xf32> to vector<11x1x16xf32>
    %cst_40 = arith.constant dense<0.000000e+00> : vector<11x1x8xf32>
    %78 = tpu.matmul %77, %70, %cst_40 {dimension_numbers = #tpu.dot_dimension_numbers<[2], [2], [1], [1], [0, 0, 0, 1, 1, 1], [0], [0]>} : vector<11x1x16xf32>, vector<11x8x16xf32>, vector<11x1x8xf32> -> vector<11x1x8xf32>
    %79 = vector.broadcast %73 : vector<11x8x1xf32> to vector<11x8x8xf32>
    %80 = vector.broadcast %78 : vector<11x1x8xf32> to vector<11x8x8xf32>
    %81 = arith.addf %79, %80 : vector<11x8x8xf32>
    %cst_41 = arith.constant 0.000000e+00 : f32
    %82 = vector.broadcast %cst_41 : f32 to vector<11x8x8xf32>
    %83 = arith.cmpf oge, %81, %82 : vector<11x8x8xf32>
    %cst_42 = arith.constant 2.000000e-01 : f32
    %84 = vector.broadcast %cst_42 : f32 to vector<11x8x8xf32>
    %85 = arith.mulf %84, %81 : vector<11x8x8xf32>
    %86 = arith.select %83, %81, %85 : vector<11x8x8xi1>, vector<11x8x8xf32>
    %87 = vector.shape_cast %33 : vector<8x8xf32> to vector<1x8x8xf32>
    %cst_43 = arith.constant 0.000000e+00 : f32
    %88 = vector.broadcast %cst_43 : f32 to vector<1x8x8xf32>
    %89 = arith.cmpf ogt, %87, %88 : vector<1x8x8xf32>
    %cst_44 = arith.constant -1.000000e+30 : f32
    %90 = vector.shape_cast %89 : vector<1x8x8xi1> to vector<1x8x8xi1>
    %91 = vector.broadcast %90 : vector<1x8x8xi1> to vector<11x8x8xi1>
    %92 = vector.broadcast %cst_44 : f32 to vector<11x8x8xf32>
    %93 = arith.select %91, %86, %92 : vector<11x8x8xi1>, vector<11x8x8xf32>
    %cst_45 = arith.constant dense<0xFF800000> : vector<11x8xf32>
    %94 = vector.multi_reduction <maximumf>, %93, %cst_45 [2] : vector<11x8x8xf32> to vector<11x8xf32>
    %95 = vector.shape_cast %94 : vector<11x8xf32> to vector<11x8x1xf32>
    %96 = vector.broadcast %95 : vector<11x8x1xf32> to vector<11x8x8xf32>
    %97 = arith.subf %93, %96 : vector<11x8x8xf32>
    %98 = math.exp %97 : vector<11x8x8xf32>
    %cst_46 = arith.constant dense<0.000000e+00> : vector<11x8xf32>
    %99 = vector.multi_reduction <add>, %98, %cst_46 [2] : vector<11x8x8xf32> to vector<11x8xf32>
    %100 = vector.shape_cast %99 : vector<11x8xf32> to vector<11x8x1xf32>
    %101 = vector.broadcast %100 : vector<11x8x1xf32> to vector<11x8x8xf32>
    %102 = arith.divf %98, %101 : vector<11x8x8xf32>
    %cst_47 = arith.constant dense<0.000000e+00> : vector<11x8x16xf32>
    %103 = tpu.matmul %102, %70, %cst_47 {dimension_numbers = #tpu.dot_dimension_numbers<[2], [1], [1], [2], [0, 0, 0, 1, 1, 2], [0], [0]>} : vector<11x8x8xf32>, vector<11x8x16xf32>, vector<11x8x16xf32> -> vector<11x8x16xf32>
    %104 = tpu.concatenate %68, %103 in 2 : vector<11x8x16xf32>, vector<11x8x16xf32> -> vector<11x8x32xf32>
    %105 = vector.shape_cast %104 : vector<11x8x32xf32> to vector<88x32xf32>
    %c0_48 = arith.constant 0 : index
    %c0_49 = arith.constant 0 : index
    %106 = vector.load %arg11[%c0_48, %c0_49] : memref<32x16xf32, #tpu.memory_space<vmem>>, vector<32x16xf32>
    %cst_50 = arith.constant dense<0.000000e+00> : vector<88x16xf32>
    %107 = tpu.matmul %105, %106, %cst_50 {dimension_numbers = #tpu.dot_dimension_numbers<[1], [0], [0], [1], [0, 0, 1, 1], [], []>} : vector<88x32xf32>, vector<32x16xf32>, vector<88x16xf32> -> vector<88x16xf32>
    %c0_51 = arith.constant 0 : index
    %c0_52 = arith.constant 0 : index
    %108 = vector.load %arg12[%c0_51, %c0_52] : memref<1x16xf32, #tpu.memory_space<vmem>>, vector<1x16xf32>
    %109 = vector.broadcast %108 : vector<1x16xf32> to vector<88x16xf32>
    %110 = arith.addf %107, %109 : vector<88x16xf32>
    %111 = vector.extract_strided_slice %0 {offsets = [2, 0, 0], sizes = [11, 8, 16], strides = [1, 1, 1]} : vector<13x8x16xf32> to vector<11x8x16xf32>
    %112 = vector.shape_cast %111 : vector<11x8x16xf32> to vector<88x16xf32>
    %113 = arith.addf %110, %112 : vector<88x16xf32>
    %c0_53 = arith.constant 0 : index
    %c0_54 = arith.constant 0 : index
    %114 = vector.load %arg13[%c0_53, %c0_54] : memref<1x16xf32, #tpu.memory_space<vmem>>, vector<1x16xf32>
    %115 = vector.broadcast %114 : vector<1x16xf32> to vector<88x16xf32>
    %116 = arith.mulf %113, %115 : vector<88x16xf32>
    %c0_55 = arith.constant 0 : index
    %c0_56 = arith.constant 0 : index
    %117 = vector.load %arg14[%c0_55, %c0_56] : memref<1x16xf32, #tpu.memory_space<vmem>>, vector<1x16xf32>
    %118 = vector.broadcast %117 : vector<1x16xf32> to vector<88x16xf32>
    %119 = arith.addf %116, %118 : vector<88x16xf32>
    %120 = vector.shape_cast %119 : vector<88x16xf32> to vector<11x8x16xf32>
    %c0_57 = arith.constant 0 : index
    %c0_58 = arith.constant 0 : index
    %c0_59 = arith.constant 0 : index
    %121 = vector.load %arg15[%c0_57, %c0_58, %c0_59] : memref<11x8x16xf32, #tpu.memory_space<vmem>>, vector<11x8x16xf32>
    tpu.vector_store %arg15[%c0_57, %c0_58, %c0_59], %120 {strides = array<i32>} : memref<11x8x16xf32, #tpu.memory_space<vmem>>, vector<11x8x16xf32>,
    return
  }
  func.func @transform_0(%arg0: i32) -> (i32, i32, i32) {
    %c0_i32 = arith.constant 0 : i32
    %c0_i32_0 = arith.constant 0 : i32
    %c0_i32_1 = arith.constant 0 : i32
    %c0_i32_2 = arith.constant 0 : i32
    return %c0_i32, %c0_i32_0, %c0_i32_1 : i32, i32, i32
  }
  func.func @transform_1(%arg0: i32) -> (i32, i32, i32) {
    %c0_i32 = arith.constant 0 : i32
    %c0_i32_0 = arith.constant 0 : i32
    %c0_i32_1 = arith.constant 0 : i32
    %c0_i32_2 = arith.constant 0 : i32
    return %c0_i32, %c0_i32_0, %c0_i32_1 : i32, i32, i32
  }
  func.func @transform_2(%arg0: i32) -> (i32, i32) {
    %c0_i32 = arith.constant 0 : i32
    %c0_i32_0 = arith.constant 0 : i32
    %c0_i32_1 = arith.constant 0 : i32
    return %c0_i32, %c0_i32_0 : i32, i32
  }
  func.func @transform_3(%arg0: i32) -> (i32, i32) {
    %c0_i32 = arith.constant 0 : i32
    %c0_i32_0 = arith.constant 0 : i32
    %c0_i32_1 = arith.constant 0 : i32
    return %c0_i32, %c0_i32_0 : i32, i32
  }
  func.func @transform_4(%arg0: i32) -> (i32, i32) {
    %c0_i32 = arith.constant 0 : i32
    %c0_i32_0 = arith.constant 0 : i32
    %c0_i32_1 = arith.constant 0 : i32
    return %c0_i32, %c0_i32_0 : i32, i32
  }
  func.func @transform_5(%arg0: i32) -> (i32, i32) {
    %c0_i32 = arith.constant 0 : i32
    %c0_i32_0 = arith.constant 0 : i32
    %c0_i32_1 = arith.constant 0 : i32
    return %c0_i32, %c0_i32_0 : i32, i32
  }
  func.func @transform_6(%arg0: i32) -> (i32, i32) {
    %c0_i32 = arith.constant 0 : i32
    %c0_i32_0 = arith.constant 0 : i32
    %c0_i32_1 = arith.constant 0 : i32
    return %c0_i32, %c0_i32_0 : i32, i32
  }
  func.func @transform_7(%arg0: i32) -> (i32, i32) {
    %c0_i32 = arith.constant 0 : i32
    %c0_i32_0 = arith.constant 0 : i32
    %c0_i32_1 = arith.constant 0 : i32
    return %c0_i32, %c0_i32_0 : i32, i32
  }
  func.func @transform_8(%arg0: i32) -> (i32, i32) {
    %c0_i32 = arith.constant 0 : i32
    %c0_i32_0 = arith.constant 0 : i32
    %c0_i32_1 = arith.constant 0 : i32
    return %c0_i32, %c0_i32_0 : i32, i32
  }
  func.func @transform_9(%arg0: i32) -> (i32, i32) {
    %c0_i32 = arith.constant 0 : i32
    %c0_i32_0 = arith.constant 0 : i32
    %c0_i32_1 = arith.constant 0 : i32
    return %c0_i32, %c0_i32_0 : i32, i32
  }
  func.func @transform_10(%arg0: i32) -> (i32, i32) {
    %c0_i32 = arith.constant 0 : i32
    %c0_i32_0 = arith.constant 0 : i32
    %c0_i32_1 = arith.constant 0 : i32
    return %c0_i32, %c0_i32_0 : i32, i32
  }
  func.func @transform_11(%arg0: i32) -> (i32, i32) {
    %c0_i32 = arith.constant 0 : i32
    %c0_i32_0 = arith.constant 0 : i32
    %c0_i32_1 = arith.constant 0 : i32
    return %c0_i32, %c0_i32_0 : i32, i32
  }
  func.func @transform_12(%arg0: i32) -> (i32, i32) {
    %c0_i32 = arith.constant 0 : i32
    %c0_i32_0 = arith.constant 0 : i32
    %c0_i32_1 = arith.constant 0 : i32
    return %c0_i32, %c0_i32_0 : i32, i32
  }
  func.func @transform_13(%arg0: i32) -> (i32, i32) {
    %c0_i32 = arith.constant 0 : i32
    %c0_i32_0 = arith.constant 0 : i32
    %c0_i32_1 = arith.constant 0 : i32
    return %c0_i32, %c0_i32_0 : i32, i32
  }
  func.func @transform_14(%arg0: i32) -> (i32, i32, i32) {
    %c0_i32 = arith.constant 0 : i32
    %c0_i32_0 = arith.constant 0 : i32
    %c0_i32_1 = arith.constant 0 : i32
    %c0_i32_2 = arith.constant 0 : i32
    return %c0_i32, %c0_i32_0, %c0_i32_1 : i32, i32, i32
  }
  func.func @transform_15(%arg0: i32) -> (i32, i32, i32) {
    %c0_i32 = arith.constant 0 : i32
    %c0_i32_0 = arith.constant 0 : i32
    %c0_i32_1 = arith.constant 0 : i32
    %c0_i32_2 = arith.constant 0 : i32
    return %c0_i32, %c0_i32_0, %c0_i32_1 : i32, i32, i32
  }
}

</mosaic_0001>

<bundles_post_ra>
// kernel: st_layer_forward.1
= control target key start
LH: loop header
LB: loop body
LE: loop exit
PB: predicated region body
PF: predicated region fallthrough
CT: control target
= control target key end

     0   :  { %21 = vsyncpa [#allocation3], 0  ;;  %s4485_s0 = inlined_call_operand.vmem [shape: f32[13,8,16], index: 0, kind: input, shape index: {}]   ;;  %s4486_s1 = inlined_call_operand.vmem [shape: f32[11,8,64], index: 1, kind: input, shape index: {}]   ;;  %s4487_s2 = inlined_call_operand.vmem [shape: f32[8,8], index: 2, kind: input, shape index: {}]   ;;  %s4488_s3 = inlined_call_operand.vmem [shape: f32[32,64], index: 3, kind: input, shape index: {}]   ;;  %s4489_s4 = inlined_call_operand.vmem [shape: f32[1,64], index: 4, kind: input, shape index: {}]   ;;  %s4490_s5 = inlined_call_operand.vmem [shape: f32[32,64], index: 5, kind: input, shape index: {}]   ;;  %s4491_s6 = inlined_call_operand.hbm [shape: f32[1,64], index: 6, kind: input, shape index: {}]   ;;  %s4492_s7 = inlined_call_operand.vmem [shape: f32[32,32], index: 7, kind: input, shape index: {}]   ;;  %s4493_s8 = inlined_call_operand.hbm [shape: f32[2,16], index: 8, kind: input, shape index: {}]   ;;  %s4494_s9 = inlined_call_operand.vmem [shape: f32[16,2], index: 9, kind: input, shape index: {}]   ;;  %s4495_s10 = inlined_call_operand.vmem [shape: f32[32,16], index: 10, kind: input, shape index: {}]   ;;  %s4496_s11 = inlined_call_operand.hbm [shape: f32[1,16], index: 11, kind: input, shape index: {}]   ;;  %s4497_s12 = inlined_call_operand.vmem [shape: f32[1,16], index: 12, kind: input, shape index: {}]   ;;  %s4498_s13 = inlined_call_operand.vmem [shape: f32[1,16], index: 13, kind: input, shape index: {}]   ;;  %s4499_s14 = inlined_call_operand.hbm [shape: f32[11,8,16], index: 14, kind: output, shape index: {0}]   ;;  %s4500_s15 = inlined_call_operand.hbm [shape: f32[11,8,64], index: 15, kind: output, shape index: {1}]  }
   0x1   :  { %22 = vsyncpa [#allocation6], 0 }
   0x2   :  { %23 = vsyncpa [#allocation4], 0  ;;  %s55_s20 = sshll.u32 %s4493_s8, 4  ;;  %s56_s20 = int_to_ptr.hbm [resolvable:$true] %s55_s20 }
   0x3   :  { %24 = vsyncpa [#allocation10], 0  ;;  %s3337_s21 = smov [#allocation5]   ;;  %s42_s25 = sshll.u32 %s4491_s6, 4  ;;  %s43_s25 = int_to_ptr.hbm [resolvable:$true] %s42_s25 }
   0x4   :  { %s57_s22 = sshll.u32 %s3337_s21, 4  ;;  %s3338_s26 = smov [#allocation2]   ;;  %s58_s22 = int_to_ptr.vmem [resolvable:$true] %s57_s22 }
   0x5   :  { %60 = dma.hbm_to_vmem [thread:$0]  %s56_s20, 32, %s58_s22, [#allocation6]  }
   0x6   :  { %s44_s27 = sshll.u32 %s3338_s26, 4  ;;  %s70_s30 = sshll.u32 %s4496_s11, 4  ;;  %s45_s27 = int_to_ptr.vmem [resolvable:$true] %s44_s27  ;;  %s71_s30 = int_to_ptr.hbm [resolvable:$true] %s70_s30 }
   0x7   :  { %47 = dma.hbm_to_vmem [thread:$0]  %s43_s25, 16, %s45_s27, [#allocation3]  }
   0x8   :  { %s3339_s8 = smov [#allocation7]  }
   0x9   :  { %s72_s16 = sshll.u32 %s3339_s8, 4  ;;  %s73_s16 = int_to_ptr.vmem [resolvable:$true] %s72_s16 }
   0xa   :  { %75 = dma.hbm_to_vmem [thread:$0]  %s71_s30, 16, %s73_s16, [#allocation6]  }
   0xb   :  { %3329 = dma.done.wait [#allocation3], 16  }
   0xc   :  { %3330 = vsyncadd [#allocation3], 4294967280 }
   0xd   :  { %3331 = dma.done.wait [#allocation6], 48  }
   0xe   :  { %3332 = vsyncadd [#allocation6], 4294967248  ;;  %v94_v0 = vld [vmem:[%s4485_s0 + $0x10] sm:$0xff]  ;;  %v96_v1 = vld [vmem:[%s4485_s0 + $0x20] sm:$0xff]  ;;  %s3340_s11 = smov 16   ;;  %vm149_vm0 = vcmask 130048  }
   0xf   :  { %116 = vrot.lane.b32.xlu0 %v94_v0, %s3340_s11  ;;  %120 = vrot.lane.b32.xlu1 %v96_v1, %s3340_s11  ;;  %v3449_v2 = vld [vmem:[%s4485_s0 + $0x30] sm:$0xff]  ;;  %v164_v3 = vld [vmem:[%s4488_s3 + $0x18] sm:$0xff]  ;;  %vm169_vm1 = vcmask 261120   ;;  %s3343_s18 = smov 112   ;;  %s3348_s27 = smov [#allocation8]  }
  0x10   :  { %124 = vrot.lane.b32.xlu2 %v3449_v2, %s3340_s11  ;;  %v163_v4 = vld [vmem:[%s4488_s3 + $0x10] sm:$0xff]  ;;  %215 = vmatpush.msra.mxu0 %v164_v3  ;;  %v95_v5 = vld [vmem:[%s4485_s0 + $0x18] sm:$0xff]  ;;  %v97_v6 = vld [vmem:[%s4485_s0 + $0x28] sm:$0xff]  ;;  %s2836_s28 = sshll.u32 %s3348_s27, 4  ;;  %s2838_s29 = sshll.u32 %s4499_s14, 4  ;;  %s2837_s28 = int_to_ptr.vmem [resolvable:$true] %s2836_s28  ;;  %s2839_s29 = int_to_ptr.hbm [resolvable:$true] %s2838_s29 }
  0x11   :  { %3013 = vmatpush.msra.mxu2 %v164_v3  ;;  %v162_v7 = vld [vmem:[%s4488_s3 + $0x8] sm:$0xff]  ;;  %v99_v8 = vld [vmem:[%s4485_s0 + $0x38] sm:$0xff]  ;;  %v100_v9 = vld [vmem:[%s4485_s0 + $0x40] sm:$0xff] }
  0x12   :  { %216 = vmatpush.msra.mxu0 %v163_v4  ;;  %v101_v10 = vld [vmem:[%s4485_s0 + $0x48] sm:$0xff]  ;;  %v102_v11 = vld [vmem:[%s4485_s0 + $0x50] sm:$0xff]  ;;  %v103_v12 = vld [vmem:[%s4485_s0 + $0x58] sm:$0xff] }
  0x13   :  { %3014 = vmatpush.msra.mxu2 %v163_v4  ;;  %v104_v13 = vld [vmem:[%s4485_s0 + $0x60] sm:$0xff]  ;;  %v93_v21 = vld [vmem:[%s4485_s0 + $0x8] sm:$0xff] }
  0x14   :  { %217 = vmatpush.msra.mxu0 %v162_v7  ;;  %v161_v14 = vld [vmem:[%s4488_s3] sm:$0xff] }
  0x15   :  { %3015 = vmatpush.msra.mxu2 %v162_v7  ;;  %v92_v17 = vld [vmem:[%s4485_s0] sm:$0xff] }
  0x16   :  { %218 = vmatpush.msra.mxu0 %v161_v14  ;;  %v3529_v39 = vld [vmem:[%s4489_s4] ss:$0 sm:$0xff]  ;;  %s3341_s4 = smov 96  }
  0x17   :  { %118 = vrot.lane.b32.xlu0 %v95_v5, %s3340_s11  ;;  %122 = vrot.lane.b32.xlu1 %v97_v6, %s3340_s11 }
  0x18   :  { %126 = vrot.lane.b32.xlu2 %v99_v8, %s3340_s11  ;;  %3016 = vmatpush.msra.mxu2 %v161_v14 }
  0x1f   :  { %128 = vrot.lane.b32.xlu0 %v100_v9, %s3340_s11  ;;  %130 = vrot.lane.b32.xlu1 %v101_v10, %s3340_s11 }
  0x20   :  { %132 = vrot.lane.b32.xlu2 %v102_v11, %s3340_s11 }
  0x27   :  { %134 = vrot.lane.b32.xlu0 %v103_v12, %s3340_s11  ;;  %136 = vrot.lane.b32.xlu1 %v104_v13, %s3340_s11 }
  0x6a   :  { %v125_v15 = vpop.permute.xlu2 %124 }
  0x6b   :  { %v154_v34 = vsel %vm149_vm0, %v96_v1, %v125_v15 }
  0x72   :  { %v127_v16 = vpop.permute.xlu2 %126 }
  0x73   :  { %v155_v36 = vsel %vm149_vm0, %v97_v6, %v127_v16 }
  0x7a   :  { %v133_v22 = vpop.permute.xlu2 %132 }
  0x7b   :  { %v158_v26 = vsel %vm149_vm0, %v100_v9, %v133_v22 }
  0x7c   :  { %2878 = vmatmul.msk.f32.vlgmr.msra.gmra.mxu2 %vm169_vm1, %v158_v26 }
  0x81   :  { %v117_v18 = vpop.permute.xlu0 %116  ;;  %v121_v19 = vpop.permute.xlu1 %120 }
  0x82   :  { %v150_v20 = vsel %vm149_vm0, %v92_v17, %v117_v18  ;;  %v152_v27 = vsel %vm149_vm0, %v94_v0, %v121_v19 }
  0x83   :  { %2870 = vmatmul.msk.f32.vlgmr.msra.gmra.mxu0 %vm169_vm1, %v150_v20 }
  0x89   :  { %v119_v23 = vpop.permute.xlu0 %118  ;;  %v123_v25 = vpop.permute.xlu1 %122 }
  0x8a   :  { %v151_v24 = vsel %vm149_vm0, %v93_v21, %v119_v23  ;;  %v153_v30 = vsel %vm149_vm0, %v95_v5, %v123_v25 }
  0x8b   :  { %2871 = vmatmul.msk.f32.gmra.mxu0 %vm169_vm1, %v151_v24 }
  0x91   :  { %v129_v28 = vpop.permute.xlu0 %128  ;;  %v131_v29 = vpop.permute.xlu1 %130 }
  0x92   :  { %v156_v37 = vsel %vm149_vm0, %v3449_v2, %v129_v28  ;;  %v157_v38 = vsel %vm149_vm0, %v99_v8, %v131_v29 }
  0x93   :  { %2872 = vmatmul.msk.f32.gmra.mxu0 %vm169_vm1, %v152_v27 }
  0x99   :  { %v135_v31 = vpop.permute.xlu0 %134  ;;  %v137_v33 = vpop.permute.xlu1 %136 }
  0x9a   :  { %v159_v32 = vsel %vm149_vm0, %v101_v10, %v135_v31  ;;  %v160_v35 = vsel %vm149_vm0, %v102_v11, %v137_v33 }
  0x9b   :  { %2873 = vmatmul.msk.f32.gmra.mxu0 %vm169_vm1, %v153_v30  ;;  %2879 = vmatmul.msk.f32.gmra.mxu2 %vm169_vm1, %v159_v32 }
  0xa3   :  { %2874 = vmatmul.msk.f32.gmra.mxu0 %vm169_vm1, %v154_v34  ;;  %2880 = vmatmul.msk.f32.gmra.mxu2 %vm169_vm1, %v160_v35 }
  0xab   :  { %2875 = vmatmul.msk.f32.gmra.mxu0 %vm169_vm1, %v155_v36 }
  0xb3   :  { %2876 = vmatmul.msk.f32.gmra.mxu0 %vm169_vm1, %v156_v37 }
  0xbb   :  { %2877 = vmatmul.msk.f32.gmra.mxu0 %vm169_vm1, %v157_v38 }
  0xff   :  { %v244_v54 = vpop.f32.mrf.mxu2 }
 0x100   :  { %v220_v40 = vpop.f32.mrf.mxu0  ;;  %v3547_v62 = vadd.f32 %v3529_v39, %v244_v54 }
 0x101   :  { %v3532_v41 = vadd.f32 %v3529_v39, %v220_v40 }
 0x102   :  { %v2889_v8 = vmul.f32 -1.442695, %v3547_v62 }
 0x103   :  { %v2881_v42 = vmul.f32 -1.442695, %v3532_v41 }
 0x105   :  { %3044 = vpow2.f32 %v2881_v42 }
 0x108   :  { %v223_v43 = vpop.f32.mrf.mxu0 }
 0x109   :  { %v3536_v44 = vadd.f32 %v3529_v39, %v223_v43 }
 0x10b   :  { %v3045_v45 = vpop.eup %3044  ;;  %v2882_v46 = vmul.f32 -1.442695, %v3536_v44 }
 0x10c   :  { %v297_v47 = vadd.f32 1.0, %v3045_v45 }
 0x10d   :  { %3046 = vpow2.f32 %v2882_v46 }
 0x10e   :  { %3048 = vrcp.f32 %v297_v47  ;;  %v319_v58 = vand.u32 2147483648, %v297_v47  ;;  %v317_v61 = vand.u32 2147483647, %v297_v47  ;;  %vm313_vm3 = vweird.f32 %v297_v47 }
 0x110   :  { %v226_v48 = vpop.f32.mrf.mxu0  ;;  %v320_v4 = vor.u32 1.1754944e-38, %v319_v58  ;;  %vm318_vm5 = vcmp.eq.f32.partialorder %v317_v61, 8.507059e+37 }
 0x111   :  { %v3540_v49 = vadd.f32 %v3529_v39, %v226_v48 }
 0x113   :  { %v3047_v50 = vpop.eup %3046  ;;  %v2883_v51 = vmul.f32 -1.442695, %v3540_v49 }
 0x114   :  { %v3049_v52 = vpop.eup %3048  ;;  %v298_v53 = vadd.f32 1.0, %v3047_v50 }
 0x115   :  { %3050 = vpow2.f32 %v2883_v51  ;;  %v309_v55 = vmul.f32 %v3049_v52, %v297_v47  ;;  %vm314_vm2 = vweird.f32 %v3049_v52 }
 0x116   :  { %3052 = vrcp.f32 %v298_v53  ;;  %vm315_vm4 = vmor %vm313_vm3, %vm314_vm2  ;;  %v334_v12 = vand.u32 2147483648, %v298_v53  ;;  %v332_v15 = vand.u32 2147483647, %v298_v53  ;;  %vm328_vm7 = vweird.f32 %v298_v53 }
 0x117   :  { %v310_v56 = vsub.f32 1.0, %v309_v55 }
 0x118   :  { %v229_v57 = vpop.f32.mrf.mxu0  ;;  %v335_v22 = vor.u32 1.1754944e-38, %v334_v12  ;;  %vm333_vm9 = vcmp.eq.f32.partialorder %v332_v15, 8.507059e+37 }
 0x119   :  { %v3544_v59 = vadd.f32 %v3529_v39, %v229_v57  ;;  %v311_v60 = vmul.f32 %v3049_v52, %v310_v56 }
 0x11b   :  { %v3051_v63 = vpop.eup %3050  ;;  %v2884_v0 = vmul.f32 -1.442695, %v3544_v59  ;;  %v312_v1 = vadd.f32 %v3049_v52, %v311_v60 }
 0x11c   :  { %v3053_v2 = vpop.eup %3052  ;;  %v299_v3 = vadd.f32 1.0, %v3051_v63 }
 0x11d   :  { %3054 = vpow2.f32 %v2884_v0  ;;  %v316_v5 = vsel %vm315_vm4, %v3049_v52, %v312_v1  ;;  %v324_v6 = vmul.f32 %v3053_v2, %v298_v53  ;;  %vm329_vm6 = vweird.f32 %v3053_v2 }
 0x11e   :  { %3056 = vrcp.f32 %v299_v3  ;;  %v321_v7 = vsel %vm318_vm5, %v320_v4, %v316_v5  ;;  %v247_v9 = vpop.f32.mrf.mxu2  ;;  %vm330_vm8 = vmor %vm328_vm7, %vm329_vm6  ;;  %v349_v31 = vand.u32 2147483648, %v299_v3  ;;  %v347_v34 = vand.u32 2147483647, %v299_v3 }
 0x11f   :  { %484 = vrot.lane.b32.xlu2 %v321_v7, %s3341_s4  ;;  %v325_v10 = vsub.f32 1.0, %v324_v6  ;;  %3058 = vpow2.f32 %v2889_v8  ;;  %v3556_v16 = vadd.f32 %v3529_v39, %v247_v9  ;;  %vm343_vm11 = vweird.f32 %v299_v3 }
 0x120   :  { %v232_v11 = vpop.f32.mrf.mxu0  ;;  %v350_v45 = vor.u32 1.1754944e-38, %v349_v31  ;;  %vm348_vm13 = vcmp.eq.f32.partialorder %v347_v34, 8.507059e+37  ;;  %v530_v31 = vld [vmem:[%s4490_s5 + $0x10] sm:$0xff] }
 0x121   :  { %v3553_v13 = vadd.f32 %v3529_v39, %v232_v11  ;;  %v326_v14 = vmul.f32 %v3053_v2, %v325_v10  ;;  %v2890_v26 = vmul.f32 -1.442695, %v3556_v16 }
 0x123   :  { %v3055_v17 = vpop.eup %3054  ;;  %v2885_v18 = vmul.f32 -1.442695, %v3553_v13  ;;  %v327_v19 = vadd.f32 %v3053_v2, %v326_v14 }
 0x124   :  { %v3057_v20 = vpop.eup %3056  ;;  %v300_v21 = vadd.f32 1.0, %v3055_v17 }
 0x125   :  { %3060 = vpow2.f32 %v2885_v18  ;;  %v331_v23 = vsel %vm330_vm8, %v3053_v2, %v327_v19  ;;  %v339_v24 = vmul.f32 %v3057_v20, %v299_v3  ;;  %v3059_v29 = vpop.eup %3058  ;;  %vm344_vm10 = vweird.f32 %v3057_v20 }
 0x126   :  { %3062 = vrcp.f32 %v300_v21  ;;  %v336_v25 = vsel %vm333_vm9, %v335_v22, %v331_v23  ;;  %v250_v28 = vpop.f32.mrf.mxu2  ;;  %v3568_v40 = vadd.f32 1.0, %v3059_v29  ;;  %vm345_vm12 = vmor %vm343_vm11, %vm344_vm10  ;;  %v364_v54 = vand.u32 2147483648, %v300_v21  ;;  %v531_v29 = vld [vmem:[%s4490_s5 + $0x18] sm:$0xff] }
 0x127   :  { %486 = vrot.lane.b32.xlu0 %v336_v25, %s3341_s4  ;;  %v340_v27 = vsub.f32 1.0, %v339_v24  ;;  %3064 = vpow2.f32 %v2890_v26  ;;  %v3565_v35 = vadd.f32 %v3529_v39, %v250_v28  ;;  %v362_v57 = vand.u32 2147483647, %v300_v21  ;;  %581 = vmatpush.msra.mxu1 %v531_v29 }
 0x128   :  { %v235_v30 = vpop.f32.mrf.mxu0  ;;  %vm358_vm15 = vweird.f32 %v300_v21  ;;  %v365_v2 = vor.u32 1.1754944e-38, %v364_v54  ;;  %vm433_vm9 = vweird.f32 %v3568_v40 }
 0x129   :  { %v3562_v32 = vadd.f32 %v3529_v39, %v235_v30  ;;  %v341_v33 = vmul.f32 %v3057_v20, %v340_v27  ;;  %v2891_v50 = vmul.f32 -1.442695, %v3565_v35  ;;  %vm363_vm3 = vcmp.eq.f32.partialorder %v362_v57, 8.507059e+37  ;;  %v656_v30 = vld [vmem:[%s4492_s7 + $0x18] sm:$0xff]  ;;  %582 = vmatpush.msra.mxu1 %v530_v31 }
 0x12a   :  { %669 = vmatpush.msrb.mxu2 %v656_v30 }
 0x12b   :  { %v3061_v36 = vpop.eup %3060  ;;  %v2886_v37 = vmul.f32 -1.442695, %v3562_v32  ;;  %v342_v38 = vadd.f32 %v3057_v20, %v341_v33 }
 0x12c   :  { %v3063_v42 = vpop.eup %3062  ;;  %v301_v43 = vadd.f32 1.0, %v3061_v36 }
 0x12d   :  { %3066 = vpow2.f32 %v2886_v37  ;;  %v346_v46 = vsel %vm345_vm12, %v3057_v20, %v342_v38  ;;  %v354_v47 = vmul.f32 %v3063_v42, %v300_v21  ;;  %v3065_v52 = vpop.eup %3064  ;;  %vm359_vm14 = vweird.f32 %v3063_v42  ;;  %v655_v37 = vld [vmem:[%s4492_s7 + $0x10] sm:$0xff] }
 0x12e   :  { %3068 = vrcp.f32 %v301_v43  ;;  %v351_v48 = vsel %vm348_vm13, %v350_v45, %v346_v46  ;;  %v3577_v63 = vadd.f32 1.0, %v3065_v52  ;;  %vm360_vm2 = vmor %vm358_vm15, %vm359_vm14  ;;  %v379_v10 = vand.u32 2147483648, %v301_v43  ;;  %v654_v45 = vld [vmem:[%s4492_s7 + $0x8] sm:$0xff]  ;;  %670 = vmatpush.msrb.mxu2 %v655_v37 }
 0x12f   :  { %488 = vrot.lane.b32.xlu1 %v351_v48, %s3341_s4  ;;  %3070 = vrcp.f32 %v3568_v40  ;;  %v355_v51 = vsub.f32 1.0, %v354_v47  ;;  %v377_v15 = vand.u32 2147483647, %v301_v43  ;;  %vm373_vm5 = vweird.f32 %v301_v43 }
 0x130   :  { %v238_v53 = vpop.f32.mrf.mxu0  ;;  %3072 = vpow2.f32 %v2891_v50  ;;  %v380_v23 = vor.u32 1.1754944e-38, %v379_v10  ;;  %v437_v48 = vand.u32 2147483647, %v3568_v40  ;;  %v439_v50 = vand.u32 2147483648, %v3568_v40  ;;  %671 = vmatpush.msrb.mxu2 %v654_v45  ;;  %v528_v45 = vld [vmem:[%s4490_s5] sm:$0xff] }
 0x131   :  { %v3574_v55 = vadd.f32 %v3529_v39, %v238_v53  ;;  %v356_v56 = vmul.f32 %v3063_v42, %v355_v51  ;;  %vm378_vm7 = vcmp.eq.f32.partialorder %v377_v15, 8.507059e+37 }
 0x132   :  { %vm438_vm15 = vcmp.eq.f32.partialorder %v437_v48, 8.507059e+37 }
 0x133   :  { %v3067_v58 = vpop.eup %3066  ;;  %v2887_v60 = vmul.f32 -1.442695, %v3574_v55  ;;  %v357_v61 = vadd.f32 %v3063_v42, %v356_v56 }
 0x134   :  { %v3069_v0 = vpop.eup %3068  ;;  %v3579_v1 = vadd.f32 1.0, %v3067_v58 }
 0x135   :  { %v3581_v3 = vpop.eup %3070  ;;  %3074 = vpow2.f32 %v2887_v60  ;;  %v361_v4 = vsel %vm360_vm2, %v3063_v42, %v357_v61  ;;  %v369_v5 = vmul.f32 %v3069_v0, %v301_v43  ;;  %vm374_vm4 = vweird.f32 %v3069_v0  ;;  %v529_v43 = vld [vmem:[%s4490_s5 + $0x8] sm:$0xff]  ;;  %s3345_s5 = smov [#allocation9]  }
 0x136   :  { %3076 = vrcp.f32 %v3579_v1  ;;  %v366_v6 = vsel %vm363_vm3, %v365_v2, %v361_v4  ;;  %v3073_v8 = vpop.eup %3072  ;;  %v429_v11 = vmul.f32 %v3581_v3, %v3568_v40  ;;  %vm375_vm6 = vmor %vm373_vm5, %vm374_vm4  ;;  %v394_v33 = vand.u32 2147483648, %v3579_v1  ;;  %583 = vmatpush.msra.mxu1 %v529_v43 }
 0x137   :  { %490 = vrot.lane.b32.xlu2 %v366_v6, %s3341_s4  ;;  %3078 = vrcp.f32 %v3577_v63  ;;  %v370_v7 = vsub.f32 1.0, %v369_v5  ;;  %v3592_v20 = vadd.f32 1.0, %v3073_v8  ;;  %v392_v42 = vand.u32 2147483647, %v3579_v1 }
 0x138   :  { %v241_v9 = vpop.f32.mrf.mxu0  ;;  %v430_v24 = vsub.f32 1.0, %v429_v11  ;;  %vm434_vm10 = vweird.f32 %v3581_v3  ;;  %vm388_vm11 = vweird.f32 %v3579_v1  ;;  %v395_v53 = vor.u32 1.1754944e-38, %v394_v33  ;;  %584 = vmatpush.msra.mxu1 %v528_v45 }
 0x139   :  { %v3589_v12 = vadd.f32 %v3529_v39, %v241_v9  ;;  %v371_v14 = vmul.f32 %v3069_v0, %v370_v7  ;;  %vm393_vm13 = vcmp.eq.f32.partialorder %v392_v42, 8.507059e+37  ;;  %vm3640_vm14 = vmor %vm433_vm9, %vm434_vm10  ;;  %vm448_vm4 = vweird.f32 %v3577_v63 }
 0x13a   :  { %v431_v34 = vmul.f32 %v3581_v3, %v430_v24  ;;  %v467_v37 = vand.u32 2147483647, %v3592_v20 }
 0x13b   :  { %v3075_v17 = vpop.eup %3074  ;;  %v2888_v18 = vmul.f32 -1.442695, %v3589_v12  ;;  %v372_v19 = vadd.f32 %v3069_v0, %v371_v14 }
 0x13c   :  { %v3077_v21 = vpop.eup %3076  ;;  %v3594_v22 = vadd.f32 1.0, %v3075_v17  ;;  %v432_v54 = vadd.f32 %v3581_v3, %v431_v34  ;;  %v454_v17 = vand.u32 2147483648, %v3577_v63  ;;  %v469_v34 = vand.u32 2147483648, %v3592_v20 }
 0x13d   :  { %v3596_v25 = vpop.eup %3078  ;;  %3080 = vpow2.f32 %v2888_v18  ;;  %v376_v39 = vsel %vm375_vm6, %v3069_v0, %v372_v19  ;;  %v384_v26 = vmul.f32 %v3077_v21, %v3579_v1  ;;  %vm389_vm8 = vweird.f32 %v3077_v21 }
 0x13e   :  { %3082 = vrcp.f32 %v3594_v22  ;;  %v381_v27 = vsel %vm378_vm7, %v380_v23, %v376_v39  ;;  %v444_v36 = vmul.f32 %v3596_v25, %v3577_v63  ;;  %vm390_vm12 = vmor %vm388_vm11, %vm389_vm8  ;;  %v440_v1 = vor.u32 1.1754944e-38, %v439_v50 }
 0x13f   :  { %492 = vrot.lane.b32.xlu0 %v381_v27, %s3341_s4  ;;  %3084 = vrcp.f32 %v3592_v20  ;;  %v385_v28 = vsub.f32 1.0, %v384_v26  ;;  %v436_v4 = vsel %vm3640_vm14, %v3581_v3, %v432_v54  ;;  %v409_v40 = vand.u32 2147483648, %v3594_v22 }
 0x140   :  { %v445_v56 = vsub.f32 1.0, %v444_v36  ;;  %vm403_vm2 = vweird.f32 %v3594_v22  ;;  %v407_v8 = vand.u32 2147483647, %v3594_v22  ;;  %vm449_vm5 = vweird.f32 %v3596_v25 }
 0x141   :  { %v386_v38 = vmul.f32 %v3077_v21, %v385_v28  ;;  %v441_v9 = vsel %vm438_vm15, %v440_v1, %v436_v4  ;;  %v452_v3 = vand.u32 2147483647, %v3577_v63  ;;  %v410_v14 = vor.u32 1.1754944e-38, %v409_v40  ;;  %vm3662_vm8 = vmor %vm448_vm4, %vm449_vm5  ;;  %v708_v40 = vld [vmem:[%s4494_s9] sm:$0xff] }
 0x142   :  { %v446_v5 = vmul.f32 %v3596_v25, %v445_v56  ;;  %vm408_vm7 = vcmp.eq.f32.partialorder %v407_v8, 8.507059e+37  ;;  %v455_v26 = vor.u32 1.1754944e-38, %v454_v17  ;;  %v470_v42 = vor.u32 1.1754944e-38, %v469_v34 }
 0x143   :  { %v3081_v46 = vpop.eup %3080  ;;  %v387_v47 = vadd.f32 %v3077_v21, %v386_v38  ;;  %vm453_vm9 = vcmp.eq.f32.partialorder %v452_v3, 8.507059e+37  ;;  %vm641_vm4 = vcmask 523264  }
 0x144   :  { %v3083_v51 = vpop.eup %3082  ;;  %v3630_v52 = vadd.f32 1.0, %v3081_v46  ;;  %v447_v15 = vadd.f32 %v3596_v25, %v446_v5  ;;  %v653_v46 = vld [vmem:[%s4492_s7] sm:$0xff]  ;;  %s2849_s7 = sshll.u32 %s3345_s5, 4  ;;  %s2850_s7 = int_to_ptr.vmem [resolvable:$true] %s2849_s7 }
 0x145   :  { %v3634_v57 = vpop.eup %3084  ;;  %v391_v58 = vsel %vm390_vm12, %v3077_v21, %v387_v47  ;;  %v399_v61 = vmul.f32 %v3083_v51, %v3594_v22  ;;  %vm404_vm3 = vweird.f32 %v3083_v51  ;;  %vm463_vm12 = vweird.f32 %v3592_v20  ;;  %672 = vmatpush.msrb.mxu2 %v653_v46 }
 0x146   :  { %3086 = vrcp.f32 %v3630_v52  ;;  %v396_v0 = vsel %vm393_vm13, %v395_v53, %v391_v58  ;;  %v459_v6 = vmul.f32 %v3634_v57, %v3592_v20  ;;  %vm405_vm6 = vmor %vm403_vm2, %vm404_vm3  ;;  %v424_v39 = vand.u32 2147483648, %v3630_v52 }
 0x147   :  { %494 = vrot.lane.b32.xlu1 %v396_v0, %s3341_s4  ;;  %v400_v2 = vsub.f32 1.0, %v399_v61  ;;  %v451_v63 = vsel %vm3662_vm8, %v3596_v25, %v447_v15  ;;  %vm418_vm10 = vweird.f32 %v3630_v52  ;;  %v422_v29 = vand.u32 2147483647, %v3630_v52 }
 0x148   :  { %v460_v18 = vsub.f32 1.0, %v459_v6  ;;  %vm464_vm13 = vweird.f32 %v3634_v57  ;;  %v425_v31 = vor.u32 1.1754944e-38, %v424_v39  ;;  %v456_v33 = vsel %vm453_vm9, %v455_v26, %v451_v63 }
 0x149   :  { %v401_v7 = vmul.f32 %v3083_v51, %v400_v2  ;;  %vm423_vm15 = vcmp.eq.f32.partialorder %v422_v29, 8.507059e+37  ;;  %vm465_vm2 = vmor %vm463_vm12, %vm464_vm13  ;;  %vm468_vm3 = vcmp.eq.f32.partialorder %v467_v37, 8.507059e+37  ;;  %3088 = vtanh.f32 %v3532_v41 }
 0x14a   :  { %v461_v27 = vmul.f32 %v3634_v57, %v460_v18  ;;  %3090 = vtanh.f32 %v3536_v44 }
 0x14b   :  { %v402_v10 = vadd.f32 %v3083_v51, %v401_v7  ;;  %3092 = vtanh.f32 %v3540_v49 }
 0x14c   :  { %v3087_v11 = vpop.eup %3086  ;;  %v462_v36 = vadd.f32 %v3634_v57, %v461_v27  ;;  %3094 = vtanh.f32 %v3544_v59  ;;  %v709_v59 = vld [vmem:[%s4494_s9 + $0x8] sm:$0xff]  ;;  %s3342_s9 = smov 127   ;;  %v621_v27 = vld [vmem:[%s4486_s1 + $0x10] sm:$0xff] }
 0x14d   :  { %v406_v19 = vsel %vm405_vm6, %v3083_v51, %v402_v10  ;;  %v414_v21 = vmul.f32 %v3087_v11, %v3630_v52  ;;  %vm419_vm11 = vweird.f32 %v3087_v11  ;;  %3096 = vtanh.f32 %v3553_v13  ;;  %757 = vmatpush.msrb.mxu0 %v709_v59  ;;  %3017 = vmatpush.msra.mxu3 %v709_v59 }
 0x14e   :  { %v411_v23 = vsel %vm408_vm7, %v410_v14, %v406_v19  ;;  %vm420_vm14 = vmor %vm418_vm10, %vm419_vm11  ;;  %v466_v43 = vsel %vm465_vm2, %v3634_v57, %v462_v36  ;;  %3098 = vtanh.f32 %v3562_v32  ;;  %v3031_v14 = vpack.i.bf16 %v708_v40, %v709_v59  ;;  %v3772_v36 = vld [vmem:[#allocation5] sm:$0x1] }
 0x14f   :  { %500 = vrot.lane.b32.xlu1 %v441_v9, %s3341_s4  ;;  %496 = vrot.lane.b32.xlu2 %v411_v23, %s3341_s4  ;;  %v415_v24 = vsub.f32 1.0, %v414_v21  ;;  %v471_v20 = vsel %vm468_vm3, %v470_v42, %v466_v43  ;;  %v3089_v47 = vpop.eup %3088  ;;  %3100 = vtanh.f32 %v3574_v55  ;;  %v620_v23 = vld [vmem:[%s4486_s1 + $0x8] sm:$0xff]  ;;  %v623_v42 = vld [vmem:[%s4486_s1 + $0x20] sm:$0xff]  ;;  %vm1141_vm7 = vcmask 64512  }
 0x150   :  { %v3091_v51 = vpop.eup %3090  ;;  %3102 = vtanh.f32 %v3589_v12  ;;  %758 = vmatpush.msrb.mxu0 %v708_v40  ;;  %3018 = vmatpush.msra.mxu3 %v708_v40  ;;  %v627_v59 = vld [vmem:[%s4486_s1 + $0x40] sm:$0xff]  ;;  %v3344_v40 = vmov 0  }
 0x151   :  { %v416_v28 = vmul.f32 %v3087_v11, %v415_v24  ;;  %v3093_v54 = vpop.eup %3092  ;;  %3104 = vtanh.f32 %v3547_v62  ;;  %3036 = vset.pattern.permute.xlu0 %v3344_v40  ;;  %3037 = vset.pattern.permute.xlu1 %v3344_v40 }
 0x152   :  { %v3095_v44 = vpop.eup %3094  ;;  %3106 = vtanh.f32 %v3556_v16  ;;  %v3729_v16 = vld [vmem:[#allocation2] ss:$0 sm:$0xff]  ;;  %3038 = vset.pattern.permute.xlu2 %v3344_v40 }
 0x153   :  { %v417_v30 = vadd.f32 %v3087_v11, %v416_v28  ;;  %v3097_v49 = vpop.eup %3096  ;;  %3108 = vtanh.f32 %v3565_v35  ;;  %v619_v35 = vld [vmem:[%s4486_s1] sm:$0xff] }
 0x154   :  { %v3099_v13 = vpop.eup %3098 }
 0x155   :  { %v421_v25 = vsel %vm420_vm14, %v3087_v11, %v417_v30  ;;  %v3101_v2 = vpop.eup %3100 }
 0x156   :  { %v426_v38 = vsel %vm423_vm15, %v425_v31, %v421_v25  ;;  %v3103_v55 = vpop.eup %3102 }
 0x157   :  { %498 = vrot.lane.b32.xlu0 %v426_v38, %s3341_s4  ;;  %502 = vrot.lane.b32.xlu2 %v456_v33, %s3341_s4  ;;  %v3105_v7 = vpop.eup %3104  ;;  %v622_v33 = vld [vmem:[%s4486_s1 + $0x18] sm:$0xff] }
 0x158   :  { %v3107_v10 = vpop.eup %3106 }
 0x159   :  { %v3109_v11 = vpop.eup %3108 }
 0x15f   :  { %504 = vrot.lane.b32.xlu0 %v471_v20, %s3341_s4  ;;  %s3346_s4 = smov 128  }
 0x167   :  { %3032 = vrot.lane.b32.xlu0 %v3031_v14, %s3342_s9  ;;  %s2851_s9 = sshll.u32 %s4500_s15, 4  ;;  %s2852_s9 = int_to_ptr.hbm [resolvable:$true] %s2851_s9 }
 0x179   :  { %v485_v48 = vpop.permute.xlu2 %484 }
 0x17a   :  { %v517_v50 = vmul.f32 %v3089_v47, %v485_v48  ;;  %v624_v47 = vld [vmem:[%s4486_s1 + $0x28] sm:$0xff] }
 0x17c   :  { %2892 = vmatmul.msk.f32.vlgmr.msra.gmra.mxu1 %vm169_vm1, %v517_v50  ;;  %2903 = vmatmul.msk.f32.vlgmr.msrb.gmra.mxu2 %vm169_vm1, %v517_v50 }
 0x191   :  { %v491_v57 = vpop.permute.xlu2 %490 }
 0x192   :  { %v520_v58 = vmul.f32 %v3095_v44, %v491_v57  ;;  %v626_v44 = vld [vmem:[%s4486_s1 + $0x38] sm:$0xff] }
 0x199   :  { %v487_v52 = vpop.permute.xlu0 %486 }
 0x19a   :  { %v518_v53 = vmul.f32 %v3091_v51, %v487_v52 }
 0x19c   :  { %2893 = vmatmul.msk.f32.gmra.mxu1 %vm169_vm1, %v518_v53  ;;  %2904 = vmatmul.msk.f32.gmra.mxu2 %vm169_vm1, %v518_v53  ;;  %v625_v53 = vld [vmem:[%s4486_s1 + $0x30] sm:$0xff] }
 0x1a1   :  { %v489_v41 = vpop.permute.xlu1 %488 }
 0x1a2   :  { %v519_v56 = vmul.f32 %v3093_v54, %v489_v41 }
 0x1a4   :  { %2894 = vmatmul.msk.f32.gmra.mxu1 %vm169_vm1, %v519_v56  ;;  %2905 = vmatmul.msk.f32.gmra.mxu2 %vm169_vm1, %v519_v56 }
 0x1a9   :  { %v497_v32 = vpop.permute.xlu2 %496 }
 0x1aa   :  { %v523_v4 = vmul.f32 %v3101_v2, %v497_v32  ;;  %v628_v2 = vld [vmem:[%s4486_s1 + $0x48] sm:$0xff] }
 0x1ac   :  { %2895 = vmatmul.msk.f32.gmra.mxu1 %vm169_vm1, %v520_v58  ;;  %2906 = vmatmul.msk.f32.gmra.mxu2 %vm169_vm1, %v520_v58 }
 0x1b1   :  { %v493_v60 = vpop.permute.xlu0 %492  ;;  %v503_v9 = vpop.permute.xlu2 %502 }
 0x1b2   :  { %v521_v61 = vmul.f32 %v3097_v49, %v493_v60  ;;  %v526_v3 = vmul.f32 %v3107_v10, %v503_v9 }
 0x1b4   :  { %2896 = vmatmul.msk.f32.gmra.mxu1 %vm169_vm1, %v521_v61  ;;  %2907 = vmatmul.msk.f32.gmra.mxu2 %vm169_vm1, %v521_v61 }
 0x1b9   :  { %v495_v0 = vpop.permute.xlu1 %494 }
 0x1ba   :  { %v522_v1 = vmul.f32 %v3099_v13, %v495_v0 }
 0x1bc   :  { %2897 = vmatmul.msk.f32.gmra.mxu1 %vm169_vm1, %v522_v1  ;;  %2908 = vmatmul.msk.f32.gmra.mxu2 %vm169_vm1, %v522_v1 }
 0x1c1   :  { %v501_v12 = vpop.permute.xlu1 %500 }
 0x1c2   :  { %v525_v8 = vmul.f32 %v3105_v7, %v501_v12  ;;  %v629_v12 = vld [vmem:[%s4486_s1 + $0x50] sm:$0xff]  ;;  %s3347_s1 = smov 8  }
 0x1c4   :  { %2898 = vmatmul.msk.f32.gmra.mxu1 %vm169_vm1, %v523_v4  ;;  %2909 = vmatmul.msk.f32.gmra.mxu2 %vm169_vm1, %v523_v4 }
 0x1c9   :  { %v499_v5 = vpop.permute.xlu0 %498 }
 0x1ca   :  { %v524_v6 = vmul.f32 %v3103_v55, %v499_v5 }
 0x1cc   :  { %2899 = vmatmul.msk.f32.gmra.mxu1 %vm169_vm1, %v524_v6  ;;  %2910 = vmatmul.msk.f32.gmra.mxu2 %vm169_vm1, %v524_v6 }
 0x1d1   :  { %v505_v62 = vpop.permute.xlu0 %504 }
 0x1d2   :  { %v527_v15 = vmul.f32 %v3109_v11, %v505_v62 }
 0x1d4   :  { %2900 = vmatmul.msk.f32.gmra.mxu1 %vm169_vm1, %v525_v8  ;;  %2911 = vmatmul.msk.f32.gmra.mxu2 %vm169_vm1, %v525_v8 }
 0x1dc   :  { %2901 = vmatmul.msk.f32.gmra.mxu1 %vm169_vm1, %v526_v3  ;;  %2912 = vmatmul.msk.f32.gmra.mxu2 %vm169_vm1, %v526_v3 }
 0x1e4   :  { %2902 = vmatmul.msk.f32.gmra.mxu1 %vm169_vm1, %v527_v15  ;;  %2913 = vmatmul.msk.f32.gmra.mxu2 %vm169_vm1, %v527_v15 }
 0x1f9   :  { %v586_v17 = vpop.f32.mrf.mxu1 }
 0x1fa   :  { %v587_v18 = vadd.f32 %v3729_v16, %v586_v17 }
 0x1fc   :  { %v630_v19 = vadd.f32 %v619_v35, %v587_v18 }
 0x1fe   :  { %642 = vst.msk [vmem:[#allocation9] sm:$0xff] %vm641_vm4, %v630_v19 }
 0x1ff   :  { %v3736_v21 = vpop.f32.mrf.mxu2 }
 0x200   :  { %1659 = vrot.lane.b32.xlu1 %v3736_v21, %s3343_s18  ;;  %2914 = vmatmul.msk.f32.vlgmr.msrb.gmra.mxu0 %vm149_vm0, %v3736_v21 }
 0x201   :  { %2925 = vmatpush.xpose.msk.msrb.mxu3 %vm149_vm0, %v3736_v21 }
 0x219   :  { %v589_v22 = vpop.f32.mrf.mxu1 }
 0x21a   :  { %v590_v24 = vadd.f32 %v3729_v16, %v589_v22 }
 0x21c   :  { %v631_v39 = vadd.f32 %v620_v23, %v590_v24 }
 0x21e   :  { %643 = vst.msk [vmem:[#allocation9 + $0x8] sm:$0xff] %vm641_vm4, %v631_v39 }
 0x21f   :  { %v3749_v63 = vpop.f32.mrf.mxu2 }
 0x220   :  { %1661 = vrot.lane.b32.xlu0 %v3749_v63, %s3343_s18  ;;  %2915 = vmatmul.msk.f32.gmra.mxu0 %vm149_vm0, %v3749_v63 }
 0x221   :  { %2927 = vmatpush.xpose.msk.msra.mxu0 %vm149_vm0, %v3749_v63  ;;  %v592_v26 = vpop.f32.mrf.mxu1 }
 0x222   :  { %v593_v28 = vadd.f32 %v3729_v16, %v592_v26 }
 0x224   :  { %v632_v29 = vadd.f32 %v621_v27, %v593_v28 }
 0x226   :  { %644 = vst.msk [vmem:[#allocation9 + $0x10] sm:$0xff] %vm641_vm4, %v632_v29  ;;  %v3895_v29 = vld [vmem:[%s4487_s2] sm:$0xff] }
 0x227   :  { %v3762_v30 = vpop.f32.mrf.mxu2  ;;  %vm1127_vm6 = vcmp.gt.f32.partialorder %v3895_v29, 0.0 }
 0x228   :  { %2916 = vmatmul.msk.f32.gmra.mxu0 %vm149_vm0, %v3762_v30  ;;  %2929 = vmatpush.xpose.msk.msrb.mxu1 %vm149_vm0, %v3762_v30 }
 0x229   :  { %v595_v31 = vpop.f32.mrf.mxu1 }
 0x22a   :  { %v596_v34 = vadd.f32 %v3729_v16, %v595_v31 }
 0x22b   :  { %2930 = vmatmul.msk.f32.vlgmr.msrb.gmra.mxu1 %vm149_vm0, %v3772_v36 }
 0x22c   :  { %v633_v25 = vadd.f32 %v622_v33, %v596_v34 }
 0x22e   :  { %645 = vst.msk [vmem:[#allocation9 + $0x18] sm:$0xff] %vm641_vm4, %v633_v25 }
 0x22f   :  { %v3777_v37 = vpop.f32.mrf.mxu2 }
 0x230   :  { %2917 = vmatmul.msk.f32.gmra.mxu0 %vm149_vm0, %v3777_v37  ;;  %2931 = vmatpush.xpose.msk.msra.mxu2 %vm149_vm0, %v3777_v37 }
 0x231   :  { %v598_v38 = vpop.f32.mrf.mxu1 }
 0x232   :  { %v599_v43 = vadd.f32 %v3729_v16, %v598_v38 }
 0x233   :  { %2932 = vmatmul.msk.f32.vlgmr.msra.gmra.mxu2 %vm149_vm0, %v3772_v36 }
 0x234   :  { %v634_v45 = vadd.f32 %v623_v42, %v599_v43 }
 0x236   :  { %646 = vst.msk [vmem:[#allocation9 + $0x20] sm:$0xff] %vm641_vm4, %v634_v45 }
 0x237   :  { %v3790_v46 = vpop.f32.mrf.mxu2 }
 0x238   :  { %2918 = vmatmul.msk.f32.gmra.mxu0 %vm149_vm0, %v3790_v46 }
 0x239   :  { %v601_v20 = vpop.f32.mrf.mxu1 }
 0x23a   :  { %v602_v48 = vadd.f32 %v3729_v16, %v601_v20 }
 0x23c   :  { %v635_v50 = vadd.f32 %v624_v47, %v602_v48 }
 0x23e   :  { %647 = vst.msk [vmem:[#allocation9 + $0x28] sm:$0xff] %vm641_vm4, %v635_v50 }
 0x23f   :  { %v3799_v51 = vpop.f32.mrf.mxu2 }
 0x240   :  { %2919 = vmatmul.msk.f32.gmra.mxu0 %vm149_vm0, %v3799_v51 }
 0x241   :  { %2935 = vmatpush.xpose.msk.msrb.mxu0 %vm149_vm0, %v3799_v51  ;;  %v604_v52 = vpop.f32.mrf.mxu1 }
 0x242   :  { %v605_v54 = vadd.f32 %v3729_v16, %v604_v52 }
 0x244   :  { %v636_v41 = vadd.f32 %v625_v53, %v605_v54 }
 0x246   :  { %648 = vst.msk [vmem:[#allocation9 + $0x30] sm:$0xff] %vm641_vm4, %v636_v41 }
 0x247   :  { %v3810_v56 = vpop.f32.mrf.mxu2 }
 0x248   :  { %2920 = vmatmul.msk.f32.gmra.mxu0 %vm149_vm0, %v3810_v56  ;;  %2937 = vmatpush.xpose.msk.msra.mxu1 %vm149_vm0, %v3810_v56 }
 0x249   :  { %v607_v57 = vpop.f32.mrf.mxu1 }
 0x24a   :  { %v608_v58 = vadd.f32 %v3729_v16, %v607_v57 }
 0x24b   :  { %2938 = vmatmul.msk.f32.vlgmr.msra.gmra.mxu1 %vm149_vm0, %v3772_v36 }
 0x24c   :  { %v637_v49 = vadd.f32 %v626_v44, %v608_v58 }
 0x24e   :  { %649 = vst.msk [vmem:[#allocation9 + $0x38] sm:$0xff] %vm641_vm4, %v637_v49 }
 0x24f   :  { %v3823_v60 = vpop.f32.mrf.mxu2 }
 0x250   :  { %2921 = vmatmul.msk.f32.vlgmr.msra.gmra.mxu3 %vm149_vm0, %v3823_v60  ;;  %2939 = vmatpush.xpose.msk.msrb.mxu2 %vm149_vm0, %v3823_v60 }
 0x251   :  { %2933 = vmatpush.xpose.msk.msra.mxu3 %vm149_vm0, %v3790_v46  ;;  %v610_v61 = vpop.f32.mrf.mxu1  ;;  %2928 = vmatmul.msk.f32.vlgmr.msra.gmra.mxu0 %vm149_vm0, %v3772_v36 }
 0x252   :  { %v611_v13 = vadd.f32 %v3729_v16, %v610_v61 }
 0x253   :  { %2940 = vmatmul.msk.f32.vlgmr.msrb.gmra.mxu2 %vm149_vm0, %v3772_v36 }
 0x254   :  { %1424 = vmatpush.msra.mxu2 %v3736_v21  ;;  %v638_v0 = vadd.f32 %v627_v59, %v611_v13  ;;  %v3888_v21 = vpop.permute.xlu0 %3032 }
 0x256   :  { %1516 = vmatpush.msrb.mxu2 %v3790_v46  ;;  %650 = vst.msk [vmem:[#allocation9 + $0x40] sm:$0xff] %vm641_vm4, %v638_v0 }
 0x257   :  { %v3842_v1 = vpop.f32.mrf.mxu2 }
 0x258   :  { %2922 = vmatmul.msk.f32.gmra.mxu3 %vm149_vm0, %v3842_v1 }
 0x259   :  { %v613_v32 = vpop.f32.mrf.mxu1  ;;  %2936 = vmatmul.msk.f32.vlgmr.msrb.gmra.mxu0 %vm149_vm0, %v3772_v36 }
 0x25a   :  { %v614_v4 = vadd.f32 %v3729_v16, %v613_v32 }
 0x25c   :  { %v639_v55 = vadd.f32 %v628_v2, %v614_v4 }
 0x25e   :  { %651 = vst.msk [vmem:[#allocation9 + $0x48] sm:$0xff] %vm641_vm4, %v639_v55 }
 0x25f   :  { %v3853_v5 = vpop.f32.mrf.mxu2 }
 0x260   :  { %2923 = vmatmul.msk.f32.gmra.mxu3 %vm149_vm0, %v3853_v5  ;;  %2943 = vmatpush.xpose.msk.msra.mxu0 %vm149_vm0, %v3853_v5 }
 0x261   :  { %v616_v6 = vpop.f32.mrf.mxu1 }
 0x262   :  { %v617_v7 = vadd.f32 %v3729_v16, %v616_v6 }
 0x263   :  { %2944 = vmatmul.msk.f32.vlgmr.msra.gmra.mxu0 %vm149_vm0, %v3772_v36 }
 0x264   :  { %1470 = vmatpush.msrb.mxu0 %v3762_v30  ;;  %v640_v8 = vadd.f32 %v629_v12, %v617_v7 }
 0x266   :  { %1562 = vmatpush.msra.mxu0 %v3810_v56  ;;  %652 = vst.msk [vmem:[#allocation9 + $0x50] sm:$0xff] %vm641_vm4, %v640_v8 }
 0x267   :  { %v3868_v9 = vpop.f32.mrf.mxu2  ;;  %2857 = dma.vmem_to_hbm [thread:$0]  %s2850_s7, 1408, %s2852_s9, [#allocation10], %s3346_s4, %s3346_s4, %s3347_s1  }
 0x268   :  { %2924 = vmatmul.msk.f32.gmra.mxu3 %vm149_vm0, %v3868_v9  ;;  %2945 = vmatpush.xpose.msk.msrb.mxu1 %vm149_vm0, %v3868_v9 }
 0x26b   :  { %2946 = vmatmul.msk.f32.vlgmr.msrb.gmra.mxu1 %vm149_vm0, %v3772_v36 }
 0x26c   :  { %1493 = vmatpush.msra.mxu1 %v3777_v37 }
 0x26e   :  { %1585 = vmatpush.msrb.mxu1 %v3823_v60 }
 0x270   :  { %2926 = vmatmul.msk.f32.vlgmr.msrb.gmra.mxu3 %vm149_vm0, %v3772_v36 }
 0x271   :  { %2941 = vmatpush.xpose.msk.msrb.mxu3 %vm149_vm0, %v3842_v1 }
 0x272   :  { %v3897_v25 = vpop.permute.xlu1 %1659 }
 0x278   :  { %2934 = vmatmul.msk.f32.vlgmr.msra.gmra.mxu3 %vm149_vm0, %v3772_v36 }
 0x279   :  { %1447 = vmatpush.msra.mxu3 %v3749_v63 }
 0x27d   :  { %v760_v10 = vpop.f32.mrf.mxu0 }
 0x27e   :  { %1019 = vperm.xlu0 %3036, %v760_v10  }
 0x280   :  { %2942 = vmatmul.msk.f32.vlgmr.msrb.gmra.mxu3 %vm149_vm0, %v3772_v36 }
 0x281   :  { %1539 = vmatpush.msrb.mxu3 %v3799_v51 }
 0x292   :  { %v3890_v24 = vpop.permute.xlu0 %1661 }
 0x29d   :  { %v763_v3 = vpop.f32.mrf.mxu0 }
 0x29e   :  { %1024 = vperm.xlu1 %3037, %v763_v3  }
 0x2a5   :  { %v766_v62 = vpop.f32.mrf.mxu0 }
 0x2a6   :  { %1029 = vperm.xlu2 %3038, %v766_v62  }
 0x2a8   :  { %v854_v22 = vpop.f32.mrf.mxu1 }
 0x2a9   :  { %v1074_v23 = vperm.slane %v854_v22, 0 }
 0x2ad   :  { %v769_v11 = vpop.f32.mrf.mxu0 }
 0x2ae   :  { %1034 = vperm.xlu1 %3037, %v769_v11  }
 0x2b5   :  { %v772_v14 = vpop.f32.mrf.mxu0 }
 0x2b6   :  { %1039 = vperm.xlu2 %3038, %v772_v14   ;;  %v874_v2 = vpop.f32.mrf.mxu2 }
 0x2b7   :  { %v1075_v4 = vperm.slane %v874_v2, 0 }
 0x2bd   :  { %v775_v15 = vpop.f32.mrf.mxu0 }
 0x2be   :  { %1044 = vperm.xlu1 %3037, %v775_v15  }
 0x2c5   :  { %v778_v16 = vpop.f32.mrf.mxu0 }
 0x2c6   :  { %1049 = vperm.xlu0 %3036, %v778_v16  }
 0x2ce   :  { %v834_v38 = vpop.f32.mrf.mxu0 }
 0x2cf   :  { %v1073_v20 = vperm.slane %v834_v38, 0 }
 0x2d3   :  { %v781_v17 = vpop.f32.mrf.mxu3 }
 0x2d4   :  { %1054 = vperm.xlu2 %3038, %v781_v17  }
 0x2d6   :  { %v954_v10 = vpop.f32.mrf.mxu2  ;;  %v914_v3 = vpop.f32.mrf.mxu0 }
 0x2d7   :  { %v1079_v62 = vperm.slane %v954_v10, 0  ;;  %v1077_v11 = vperm.slane %v914_v3, 0 }
 0x2db   :  { %v784_v35 = vpop.f32.mrf.mxu3 }
 0x2dc   :  { %1059 = vperm.xlu0 %3036, %v784_v35  }
 0x2e3   :  { %v787_v18 = vpop.f32.mrf.mxu3 }
 0x2e4   :  { %1064 = vperm.xlu2 %3038, %v787_v18   ;;  %v934_v18 = vpop.f32.mrf.mxu1 }
 0x2eb   :  { %v790_v19 = vpop.f32.mrf.mxu3 }
 0x2ec   :  { %1069 = vperm.xlu0 %3036, %v790_v19  }
 0x2f0   :  { %v1020_v31 = vpop.permute.xlu0 %1019 }
 0x2f3   :  { %v814_v39 = vpop.f32.mrf.mxu3 }
 0x2f4   :  { %v1072_v27 = vperm.slane %v814_v39, 0 }
 0x2f6   :  { %v1083_v34 = vadd.f32 %v1072_v27, %v1020_v31 }
 0x2f8   :  { %v1105_v43 = vmul.f32 0.2, %v1083_v34  ;;  %vm1094_vm8 = vcmp.ge.f32.partialorder %v1083_v34, 0.0 }
 0x2fa   :  { %v1116_v48 = vsel %vm1094_vm8, %v1083_v34, %v1105_v43 }
 0x2fb   :  { %v894_v42 = vpop.f32.mrf.mxu3  ;;  %v3908_v41 = vsel %vm1127_vm6, %v1116_v48, -1e+30 }
 0x2fc   :  { %v1076_v47 = vperm.slane %v894_v42, 0  ;;  %v1142_v58 = vsel %vm1141_vm7, %v3908_v41, -inf }
 0x300   :  { %v1030_v63 = vpop.permute.xlu2 %1029 }
 0x301   :  { %v1085_v26 = vadd.f32 %v1074_v23, %v1030_v63  ;;  %v1078_v63 = vperm.slane %v934_v18, 0 }
 0x303   :  { %v1107_v28 = vmul.f32 0.2, %v1085_v26  ;;  %vm1096_vm5 = vcmp.ge.f32.partialorder %v1085_v26, 0.0 }
 0x305   :  { %v1118_v33 = vsel %vm1096_vm5, %v1085_v26, %v1107_v28 }
 0x306   :  { %v3902_v36 = vsel %vm1127_vm6, %v1118_v33, -1e+30  ;;  %v994_v33 = vpop.f32.mrf.mxu0 }
 0x307   :  { %v1148_v45 = vsel %vm1141_vm7, %v3902_v36, -inf  ;;  %v1081_v42 = vperm.slane %v994_v33, 0 }
 0x30d   :  { %1149 = vmax.xlane.f32.xlu2 %v1148_v45 }
 0x310   :  { %v1025_v50 = vpop.permute.xlu1 %1024  ;;  %v1040_v52 = vpop.permute.xlu2 %1039 }
 0x311   :  { %v1084_v53 = vadd.f32 %v1073_v20, %v1025_v50  ;;  %v1087_v54 = vadd.f32 %v1076_v47, %v1040_v52 }
 0x313   :  { %v1106_v57 = vmul.f32 0.2, %v1084_v53  ;;  %v1109_v44 = vmul.f32 0.2, %v1087_v54  ;;  %vm1095_vm9 = vcmp.ge.f32.partialorder %v1084_v53, 0.0  ;;  %vm1098_vm10 = vcmp.ge.f32.partialorder %v1087_v54, 0.0 }
 0x315   :  { %v1117_v49 = vsel %vm1095_vm9, %v1084_v53, %v1106_v57  ;;  %v1120_v61 = vsel %vm1098_vm10, %v1087_v54, %v1109_v44  ;;  %v974_v57 = vpop.f32.mrf.mxu3 }
 0x316   :  { %1143 = vmax.xlane.f32.xlu0 %v1142_v58  ;;  %v3914_v59 = vsel %vm1127_vm6, %v1117_v49, -1e+30  ;;  %v3918_v13 = vsel %vm1127_vm6, %v1120_v61, -1e+30  ;;  %v1080_v44 = vperm.slane %v974_v57, 0 }
 0x317   :  { %v1145_v0 = vsel %vm1141_vm7, %v3914_v59, -inf  ;;  %v1154_v32 = vsel %vm1141_vm7, %v3918_v13, -inf }
 0x318   :  { %1146 = vmax.xlane.f32.xlu1 %v1145_v0  ;;  %1155 = vmax.xlane.f32.xlu2 %v1154_v32 }
 0x320   :  { %v1035_v40 = vpop.permute.xlu1 %1034 }
 0x321   :  { %v1086_v55 = vadd.f32 %v1075_v4, %v1035_v40  ;;  %v1014_v4 = vpop.f32.mrf.mxu1 }
 0x322   :  { %v1082_v40 = vperm.slane %v1014_v4, 0 }
 0x323   :  { %v1108_v6 = vmul.f32 0.2, %v1086_v55  ;;  %vm1097_vm11 = vcmp.ge.f32.partialorder %v1086_v55, 0.0 }
 0x325   :  { %v1119_v12 = vsel %vm1097_vm11, %v1086_v55, %v1108_v6 }
 0x326   :  { %v3926_v7 = vsel %vm1127_vm6, %v1119_v12, -1e+30 }
 0x327   :  { %v1151_v8 = vsel %vm1141_vm7, %v3926_v7, -inf }
 0x328   :  { %1152 = vmax.xlane.f32.xlu1 %v1151_v8 }
 0x32e   :  { %v1055_v14 = vpop.permute.xlu2 %1054 }
 0x32f   :  { %v1090_v15 = vadd.f32 %v1079_v62, %v1055_v14 }
 0x330   :  { %v1045_v16 = vpop.permute.xlu1 %1044 }
 0x331   :  { %v1112_v17 = vmul.f32 0.2, %v1090_v15  ;;  %v1088_v35 = vadd.f32 %v1077_v11, %v1045_v16  ;;  %vm1101_vm12 = vcmp.ge.f32.partialorder %v1090_v15, 0.0 }
 0x333   :  { %v1110_v19 = vmul.f32 0.2, %v1088_v35  ;;  %v1123_v22 = vsel %vm1101_vm12, %v1090_v15, %v1112_v17  ;;  %vm1099_vm13 = vcmp.ge.f32.partialorder %v1088_v35, 0.0 }
 0x334   :  { %v3932_v23 = vsel %vm1127_vm6, %v1123_v22, -1e+30 }
 0x335   :  { %v1163_v39 = vsel %vm1141_vm7, %v3932_v23, -inf  ;;  %v1121_v26 = vsel %vm1099_vm13, %v1088_v35, %v1110_v19 }
 0x336   :  { %1164 = vmax.xlane.f32.xlu2 %v1163_v39  ;;  %v3938_v27 = vsel %vm1127_vm6, %v1121_v26, -1e+30 }
 0x337   :  { %v1157_v28 = vsel %vm1141_vm7, %v3938_v27, -inf }
 0x338   :  { %v1050_v31 = vpop.permute.xlu0 %1049  ;;  %1158 = vmax.xlane.f32.xlu1 %v1157_v28 }
 0x339   :  { %v1089_v34 = vadd.f32 %v1078_v63, %v1050_v31 }
 0x33b   :  { %v1111_v38 = vmul.f32 0.2, %v1089_v34  ;;  %vm1100_vm14 = vcmp.ge.f32.partialorder %v1089_v34, 0.0 }
 0x33d   :  { %v1122_v43 = vsel %vm1100_vm14, %v1089_v34, %v1111_v38 }
 0x33e   :  { %v1065_v45 = vpop.permute.xlu2 %1064  ;;  %v3944_v20 = vsel %vm1127_vm6, %v1122_v43, -1e+30 }
 0x33f   :  { %v1092_v47 = vadd.f32 %v1081_v42, %v1065_v45  ;;  %v1160_v48 = vsel %vm1141_vm7, %v3944_v20, -inf }
 0x340   :  { %1161 = vmax.xlane.f32.xlu1 %v1160_v48 }
 0x341   :  { %v1114_v50 = vmul.f32 0.2, %v1092_v47  ;;  %vm1103_vm15 = vcmp.ge.f32.partialorder %v1092_v47, 0.0 }
 0x343   :  { %v1125_v52 = vsel %vm1103_vm15, %v1092_v47, %v1114_v50 }
 0x344   :  { %v3950_v53 = vsel %vm1127_vm6, %v1125_v52, -1e+30 }
 0x345   :  { %v1169_v54 = vsel %vm1141_vm7, %v3950_v53, -inf }
 0x346   :  { %1170 = vmax.xlane.f32.xlu2 %v1169_v54 }
 0x34e   :  { %v1060_v58 = vpop.permute.xlu0 %1059 }
 0x34f   :  { %v1091_v49 = vadd.f32 %v1080_v44, %v1060_v58 }
 0x351   :  { %v1113_v61 = vmul.f32 0.2, %v1091_v49  ;;  %vm1102_vm2 = vcmp.ge.f32.partialorder %v1091_v49, 0.0 }
 0x353   :  { %v1124_v0 = vsel %vm1102_vm2, %v1091_v49, %v1113_v61 }
 0x354   :  { %v3956_v32 = vsel %vm1127_vm6, %v1124_v0, -1e+30 }
 0x355   :  { %v1166_v2 = vsel %vm1141_vm7, %v3956_v32, -inf }
 0x356   :  { %1167 = vmax.xlane.f32.xlu1 %v1166_v2 }
 0x35e   :  { %v1070_v55 = vpop.permute.xlu0 %1069 }
 0x35f   :  { %v1093_v6 = vadd.f32 %v1082_v40, %v1070_v55 }
 0x361   :  { %v1115_v12 = vmul.f32 0.2, %v1093_v6  ;;  %vm1104_vm3 = vcmp.ge.f32.partialorder %v1093_v6, 0.0 }
 0x363   :  { %v1126_v8 = vsel %vm1104_vm3, %v1093_v6, %v1115_v12 }
 0x364   :  { %v3962_v10 = vsel %vm1127_vm6, %v1126_v8, -1e+30 }
 0x365   :  { %v1172_v3 = vsel %vm1141_vm7, %v3962_v10, -inf }
 0x366   :  { %1173 = vmax.xlane.f32.xlu0 %v1172_v3 }
 0x380   :  { %v1150_v14 = vpop.xlane.xlu2 %1149 }
 0x381   :  { %v1177_v35 = vsub.f32 %v3902_v36, %v1150_v14 }
 0x383   :  { %v1190_v19 = vmul.f32 1.442695, %v1177_v35 }
 0x389   :  { %v1144_v62 = vpop.xlane.xlu0 %1143 }
 0x38a   :  { %v1175_v11 = vsub.f32 %v3908_v41, %v1144_v62 }
 0x38b   :  { %v1147_v15 = vpop.xlane.xlu1 %1146  ;;  %v1156_v22 = vpop.xlane.xlu2 %1155 }
 0x38c   :  { %v1186_v16 = vmul.f32 1.442695, %v1175_v11  ;;  %v1176_v17 = vsub.f32 %v3914_v59, %v1147_v15  ;;  %v1179_v41 = vsub.f32 %v3918_v13, %v1156_v22 }
 0x38e   :  { %3110 = vpow2.f32 %v1186_v16  ;;  %v1188_v18 = vmul.f32 1.442695, %v1176_v17  ;;  %v1194_v36 = vmul.f32 1.442695, %v1179_v41 }
 0x390   :  { %3112 = vpow2.f32 %v1188_v18 }
 0x391   :  { %3114 = vpow2.f32 %v1190_v19 }
 0x392   :  { %3116 = vpow2.f32 %v1194_v36 }
 0x394   :  { %v3969_v39 = vpop.eup %3110 }
 0x395   :  { %v1208_v63 = vsel %vm1141_vm7, %v3969_v39, 0.0 }
 0x396   :  { %v3973_v26 = vpop.eup %3112  ;;  %1209 = vadd.xlane.f32.xlu1 %v1208_v63 }
 0x397   :  { %v1211_v59 = vsel %vm1141_vm7, %v3973_v26, 0.0  ;;  %v3978_v31 = vpop.eup %3114 }
 0x398   :  { %1212 = vadd.xlane.f32.xlu2 %v1211_v59  ;;  %v1214_v38 = vsel %vm1141_vm7, %v3978_v31, 0.0  ;;  %v3983_v42 = vpop.eup %3116 }
 0x399   :  { %v1220_v43 = vsel %vm1141_vm7, %v3983_v42, 0.0 }
 0x39b   :  { %v1153_v28 = vpop.xlane.xlu1 %1152 }
 0x39c   :  { %v1178_v33 = vsub.f32 %v3926_v7, %v1153_v28 }
 0x39e   :  { %v1192_v34 = vmul.f32 1.442695, %v1178_v33 }
 0x3a0   :  { %3118 = vpow2.f32 %v1192_v34  ;;  %1215 = vadd.xlane.f32.xlu2 %v1214_v38 }
 0x3a6   :  { %v3985_v13 = vpop.eup %3118 }
 0x3a7   :  { %v1217_v45 = vsel %vm1141_vm7, %v3985_v13, 0.0 }
 0x3a8   :  { %1221 = vadd.xlane.f32.xlu2 %v1220_v43  ;;  %1218 = vadd.xlane.f32.xlu0 %v1217_v45 }
 0x3a9   :  { %v1165_v7 = vpop.xlane.xlu2 %1164 }
 0x3aa   :  { %v1182_v50 = vsub.f32 %v3932_v23, %v1165_v7 }
 0x3ab   :  { %v1159_v47 = vpop.xlane.xlu1 %1158 }
 0x3ac   :  { %v1180_v48 = vsub.f32 %v3938_v27, %v1159_v47  ;;  %v1200_v54 = vmul.f32 1.442695, %v1182_v50 }
 0x3ae   :  { %v1196_v52 = vmul.f32 1.442695, %v1180_v48 }
 0x3af   :  { %1665 = vrot.lane.b32.xlu1 %v3777_v37, %s3343_s18 }
 0x3b0   :  { %3120 = vpow2.f32 %v1196_v52 }
 0x3b1   :  { %3122 = vpow2.f32 %v1200_v54 }
 0x3b3   :  { %v1162_v27 = vpop.xlane.xlu1 %1161 }
 0x3b4   :  { %v1181_v3 = vsub.f32 %v3944_v20, %v1162_v27 }
 0x3b6   :  { %v3995_v57 = vpop.eup %3120 }
 0x3b7   :  { %v1223_v44 = vsel %vm1141_vm7, %v3995_v57, 0.0  ;;  %v3999_v58 = vpop.eup %3122 }
 0x3b8   :  { %1224 = vadd.xlane.f32.xlu2 %v1223_v44  ;;  %v1229_v23 = vsel %vm1141_vm7, %v3999_v58, 0.0 }
 0x3b9   :  { %v1171_v0 = vpop.xlane.xlu2 %1170 }
 0x3ba   :  { %v1184_v2 = vsub.f32 %v3950_v53, %v1171_v0 }
 0x3bc   :  { %1667 = vrot.lane.b32.xlu0 %v3790_v46, %s3343_s18  ;;  %v1204_v40 = vmul.f32 1.442695, %v1184_v2 }
 0x3c0   :  { %1230 = vadd.xlane.f32.xlu2 %v1229_v23 }
 0x3c9   :  { %v1168_v37 = vpop.xlane.xlu1 %1167 }
 0x3ca   :  { %v1183_v49 = vsub.f32 %v3956_v32, %v1168_v37 }
 0x3cc   :  { %v1202_v61 = vmul.f32 1.442695, %v1183_v49 }
 0x3ce   :  { %3124 = vpow2.f32 %v1202_v61 }
 0x3cf   :  { %3126 = vpow2.f32 %v1204_v40 }
 0x3d4   :  { %v4007_v4 = vpop.eup %3124 }
 0x3d5   :  { %v1232_v46 = vsel %vm1141_vm7, %v4007_v4, 0.0  ;;  %v4014_v12 = vpop.eup %3126 }
 0x3d6   :  { %v1235_v53 = vsel %vm1141_vm7, %v4014_v12, 0.0 }
 0x3d8   :  { %1663 = vrot.lane.b32.xlu2 %v3762_v30, %s3343_s18 }
 0x3d9   :  { %1233 = vadd.xlane.f32.xlu1 %v1232_v46  ;;  %v1174_v55 = vpop.xlane.xlu0 %1173 }
 0x3da   :  { %v1185_v6 = vsub.f32 %v3962_v10, %v1174_v55  ;;  %v1198_v10 = vmul.f32 1.442695, %v1181_v3 }
 0x3dc   :  { %v1206_v32 = vmul.f32 1.442695, %v1185_v6 }
 0x3de   :  { %3128 = vpow2.f32 %v1206_v32 }
 0x3df   :  { %3130 = vpow2.f32 %v1198_v10 }
 0x3e4   :  { %v4018_v8 = vpop.eup %3128 }
 0x3e5   :  { %v1238_v30 = vsel %vm1141_vm7, %v4018_v8, 0.0  ;;  %v4027_v62 = vpop.eup %3130 }
 0x3e6   :  { %1236 = vadd.xlane.f32.xlu0 %v1235_v53  ;;  %v1226_v11 = vsel %vm1141_vm7, %v4027_v62, 0.0 }
 0x3ee   :  { %1239 = vadd.xlane.f32.xlu0 %v1238_v30 }
 0x3f2   :  { %1669 = vrot.lane.b32.xlu1 %v3799_v51, %s3343_s18 }
 0x3fa   :  { %1675 = vrot.lane.b32.xlu1 %v3842_v1, %s3343_s18 }
 0x401   :  { %1227 = vadd.xlane.f32.xlu2 %v1226_v11 }
 0x402   :  { %1679 = vrot.lane.b32.xlu1 %v3868_v9, %s3343_s18  ;;  %1673 = vrot.lane.b32.xlu0 %v3823_v60, %s3343_s18 }
 0x409   :  { %v1210_v20 = vpop.xlane.xlu1 %1209 }
 0x40a   :  { %3132 = vrcp.f32 %v1210_v20  ;;  %1677 = vrot.lane.b32.xlu0 %v3853_v5, %s3343_s18  ;;  %v1252_v19 = vand.u32 2147483648, %v1210_v20  ;;  %v1250_v63 = vand.u32 2147483647, %v1210_v20  ;;  %vm1246_vm5 = vweird.f32 %v1210_v20 }
 0x40b   :  { %v1213_v51 = vpop.xlane.xlu2 %1212 }
 0x40c   :  { %3134 = vrcp.f32 %v1213_v51  ;;  %v1267_v60 = vand.u32 2147483648, %v1213_v51  ;;  %v1265_v28 = vand.u32 2147483647, %v1213_v51  ;;  %v1253_v33 = vor.u32 1.1754944e-38, %v1252_v19 }
 0x40d   :  { %vm1251_vm10 = vcmp.eq.f32.partialorder %v1250_v63, 8.507059e+37  ;;  %vm1261_vm11 = vweird.f32 %v1213_v51  ;;  %v3035_v63 = vunpack.i.h.bf16 %v3888_v21 }
 0x40e   :  { %v1268_v7 = vor.u32 1.1754944e-38, %v1267_v60  ;;  %vm1266_vm13 = vcmp.eq.f32.partialorder %v1265_v28, 8.507059e+37 }
 0x410   :  { %v3133_v14 = vpop.eup %3132 }
 0x411   :  { %v1242_v15 = vmul.f32 %v3133_v14, %v1210_v20  ;;  %vm1247_vm4 = vweird.f32 %v3133_v14 }
 0x412   :  { %v3135_v16 = vpop.eup %3134  ;;  %vm1248_vm9 = vmor %vm1246_vm5, %vm1247_vm4 }
 0x413   :  { %v1243_v17 = vsub.f32 1.0, %v1242_v15  ;;  %v1257_v35 = vmul.f32 %v3135_v16, %v1213_v51  ;;  %v1216_v18 = vpop.xlane.xlu2 %1215  ;;  %vm1262_vm8 = vweird.f32 %v3135_v16 }
 0x414   :  { %3136 = vrcp.f32 %v1216_v18  ;;  %vm1263_vm12 = vmor %vm1261_vm11, %vm1262_vm8  ;;  %v1282_v27 = vand.u32 2147483648, %v1216_v18  ;;  %v1280_v49 = vand.u32 2147483647, %v1216_v18  ;;  %vm1276_vm15 = vweird.f32 %v1216_v18 }
 0x415   :  { %v1244_v22 = vmul.f32 %v3133_v14, %v1243_v17  ;;  %v1258_v41 = vsub.f32 1.0, %v1257_v35 }
 0x416   :  { %v1283_v0 = vor.u32 1.1754944e-38, %v1282_v27  ;;  %vm1281_vm3 = vcmp.eq.f32.partialorder %v1280_v49, 8.507059e+37 }
 0x417   :  { %v1245_v59 = vadd.f32 %v3133_v14, %v1244_v22  ;;  %v1259_v36 = vmul.f32 %v3135_v16, %v1258_v41  ;;  %v3034_v22 = vunpack.i.l.bf16 %v3888_v21 }
 0x419   :  { %v1249_v34 = vsel %vm1248_vm9, %v3133_v14, %v1245_v59  ;;  %v1260_v38 = vadd.f32 %v3135_v16, %v1259_v36  ;;  %1671 = vrot.lane.b32.xlu2 %v3810_v56, %s3343_s18 }
 0x41a   :  { %v3137_v43 = vpop.eup %3136  ;;  %v1254_v45 = vsel %vm1251_vm10, %v1253_v33, %v1249_v34 }
 0x41b   :  { %v1264_v47 = vsel %vm1263_vm12, %v3135_v16, %v1260_v38  ;;  %v1272_v48 = vmul.f32 %v3137_v43, %v1216_v18  ;;  %v1222_v50 = vpop.xlane.xlu2 %1221  ;;  %v1219_v52 = vpop.xlane.xlu0 %1218  ;;  %v1255_v54 = vmul.f32 %v3969_v39, %v1254_v45  ;;  %vm1277_vm14 = vweird.f32 %v3137_v43 }
 0x41c   :  { %v1269_v44 = vsel %vm1266_vm13, %v1268_v7, %v1264_v47  ;;  %3138 = vrcp.f32 %v1222_v50  ;;  %vm1278_vm2 = vmor %vm1276_vm15, %vm1277_vm14  ;;  %v1312_v32 = vand.u32 2147483648, %v1222_v50  ;;  %v1310_v3 = vand.u32 2147483647, %v1222_v50 }
 0x41d   :  { %v1273_v23 = vsub.f32 1.0, %v1272_v48  ;;  %3140 = vrcp.f32 %v1219_v52  ;;  %2947 = vmatmul.msk.f32.vlgmr.msra.gmra.mxu2 %vm1141_vm7, %v1255_v54  ;;  %v1270_v56 = vmul.f32 %v3973_v26, %v1269_v44  ;;  %v1297_v10 = vand.u32 2147483648, %v1219_v52 }
 0x41e   :  { %1608 = vmatpush.msra.mxu2 %v3842_v1  ;;  %v1295_v11 = vand.u32 2147483647, %v1219_v52  ;;  %vm1306_vm8 = vweird.f32 %v1222_v50  ;;  %v1313_v51 = vor.u32 1.1754944e-38, %v1312_v32  ;;  %vm1291_vm10 = vweird.f32 %v1219_v52 }
 0x41f   :  { %v1274_v37 = vmul.f32 %v3137_v43, %v1273_v23  ;;  %2948 = vmatmul.msk.f32.vlgmr.msra.gmra.mxu3 %vm1141_vm7, %v1270_v56  ;;  %vm1311_vm11 = vcmp.eq.f32.partialorder %v1310_v3, 8.507059e+37  ;;  %v1298_v15 = vor.u32 1.1754944e-38, %v1297_v10 }
 0x420   :  { %1631 = vmatpush.msra.mxu3 %v3853_v5  ;;  %vm1296_vm13 = vcmp.eq.f32.partialorder %v1295_v11, 8.507059e+37 }
 0x421   :  { %v1275_v61 = vadd.f32 %v3137_v43, %v1274_v37  ;;  %v4060_v27 = vpop.permute.xlu1 %1665 }
 0x422   :  { %v3139_v39 = vpop.eup %3138 }
 0x423   :  { %v3141_v2 = vpop.eup %3140  ;;  %v1279_v40 = vsel %vm1278_vm2, %v3137_v43, %v1275_v61  ;;  %v1302_v46 = vmul.f32 %v3139_v39, %v1222_v50  ;;  %vm1307_vm4 = vweird.f32 %v3139_v39 }
 0x424   :  { %v1284_v55 = vsel %vm1281_vm3, %v1283_v0, %v1279_v40  ;;  %v1287_v1 = vmul.f32 %v3141_v2, %v1219_v52  ;;  %vm1292_vm5 = vweird.f32 %v3141_v2  ;;  %vm1308_vm9 = vmor %vm1306_vm8, %vm1307_vm4 }
 0x425   :  { %v1303_v6 = vsub.f32 1.0, %v1302_v46  ;;  %v1285_v26 = vmul.f32 %v3978_v31, %v1284_v55  ;;  %vm1293_vm12 = vmor %vm1291_vm10, %vm1292_vm5 }
 0x426   :  { %v1288_v53 = vsub.f32 1.0, %v1287_v1 }
 0x427   :  { %v1304_v30 = vmul.f32 %v3139_v39, %v1303_v6  ;;  %2949 = vmatmul.msk.f32.vlgmr.msrb.gmra.mxu0 %vm1141_vm7, %v1285_v26 }
 0x428   :  { %v1289_v5 = vmul.f32 %v3141_v2, %v1288_v53  ;;  %1654 = vmatpush.msrb.mxu0 %v3868_v9 }
 0x429   :  { %v1305_v20 = vadd.f32 %v3139_v39, %v1304_v30 }
 0x42a   :  { %v1290_v14 = vadd.f32 %v3141_v2, %v1289_v5 }
 0x42b   :  { %v1309_v31 = vsel %vm1308_vm9, %v3139_v39, %v1305_v20  ;;  %v1225_v16 = vpop.xlane.xlu2 %1224 }
 0x42c   :  { %v1314_v17 = vsel %vm1311_vm11, %v1313_v51, %v1309_v31  ;;  %v1294_v35 = vsel %vm1293_vm12, %v3141_v2, %v1290_v14  ;;  %3142 = vrcp.f32 %v1225_v16  ;;  %v1327_v36 = vand.u32 2147483648, %v1225_v16  ;;  %v4078_v51 = vld [vmem:[#allocation5 + $0x1] sm:$0x1] }
 0x42d   :  { %v1299_v18 = vsel %vm1296_vm13, %v1298_v15, %v1294_v35  ;;  %v1315_v19 = vmul.f32 %v3983_v42, %v1314_v17  ;;  %v1325_v28 = vand.u32 2147483647, %v1225_v16  ;;  %vm1321_vm15 = vweird.f32 %v1225_v16 }
 0x42e   :  { %v1300_v9 = vmul.f32 %v3985_v13, %v1299_v18  ;;  %v1328_v38 = vor.u32 1.1754944e-38, %v1327_v36  ;;  %v4066_v49 = vpop.permute.xlu0 %1667 }
 0x42f   :  { %2951 = vmatmul.msk.f32.vlgmr.msrb.gmra.mxu2 %vm1141_vm7, %v1315_v19  ;;  %vm1326_vm3 = vcmp.eq.f32.partialorder %v1325_v28, 8.507059e+37 }
 0x430   :  { %2950 = vmatmul.msk.f32.vlgmr.msra.gmra.mxu1 %vm1141_vm7, %v1300_v9  ;;  %2969 = vmatpush.xpose.msk.msrb.mxu2 %vm149_vm0, %v3897_v25 }
 0x431   :  { %1725 = vmatpush.msra.mxu1 %v3034_v22 }
 0x432   :  { %v3143_v41 = vpop.eup %3142 }
 0x433   :  { %v1317_v60 = vmul.f32 %v3143_v41, %v1225_v16  ;;  %1726 = vmatpush.msra.mxu1 %v3035_v63  ;;  %v1231_v59 = vpop.xlane.xlu2 %1230  ;;  %vm1322_vm14 = vweird.f32 %v3143_v41 }
 0x434   :  { %3144 = vrcp.f32 %v1231_v59  ;;  %vm1323_vm2 = vmor %vm1321_vm15, %vm1322_vm14  ;;  %v1357_v48 = vand.u32 2147483648, %v1231_v59  ;;  %v1355_v52 = vand.u32 2147483647, %v1231_v59  ;;  %vm1351_vm5 = vweird.f32 %v1231_v59 }
 0x435   :  { %v1318_v42 = vsub.f32 1.0, %v1317_v60 }
 0x436   :  { %v1358_v44 = vor.u32 1.1754944e-38, %v1357_v48  ;;  %vm1356_vm9 = vcmp.eq.f32.partialorder %v1355_v52, 8.507059e+37 }
 0x437   :  { %v1319_v13 = vmul.f32 %v3143_v41, %v1318_v42 }
 0x439   :  { %v1320_v33 = vadd.f32 %v3143_v41, %v1319_v13 }
 0x43a   :  { %v3145_v34 = vpop.eup %3144 }
 0x43b   :  { %v1324_v43 = vsel %vm1323_vm2, %v3143_v41, %v1320_v33  ;;  %v1347_v45 = vmul.f32 %v3145_v34, %v1231_v59  ;;  %vm1352_vm4 = vweird.f32 %v3145_v34  ;;  %v4070_v32 = vpop.permute.xlu2 %1663 }
 0x43c   :  { %v1329_v21 = vsel %vm1326_vm3, %v1328_v38, %v1324_v43  ;;  %vm1353_vm8 = vmor %vm1351_vm5, %vm1352_vm4 }
 0x43d   :  { %v1348_v7 = vsub.f32 1.0, %v1347_v45  ;;  %v1330_v47 = vmul.f32 %v3995_v57, %v1329_v21 }
 0x43f   :  { %v1349_v50 = vmul.f32 %v3145_v34, %v1348_v7  ;;  %2952 = vmatmul.msk.f32.vlgmr.msrb.gmra.mxu3 %vm1141_vm7, %v1330_v47 }
 0x440   :  { %2971 = vmatpush.xpose.msk.msrb.mxu3 %vm149_vm0, %v3890_v24 }
 0x441   :  { %v1350_v54 = vadd.f32 %v3145_v34, %v1349_v50 }
 0x443   :  { %v1354_v23 = vsel %vm1353_vm8, %v3145_v34, %v1350_v54 }
 0x444   :  { %v1359_v56 = vsel %vm1356_vm9, %v1358_v44, %v1354_v23 }
 0x445   :  { %v1360_v57 = vmul.f32 %v3999_v58, %v1359_v56 }
 0x447   :  { %2954 = vmatmul.msk.f32.vlgmr.msrb.gmra.mxu1 %vm1141_vm7, %v1360_v57 }
 0x44c   :  { %v1234_v37 = vpop.xlane.xlu1 %1233 }
 0x44d   :  { %3146 = vrcp.f32 %v1234_v37  ;;  %v1372_v2 = vand.u32 2147483648, %v1234_v37  ;;  %v1370_v46 = vand.u32 2147483647, %v1234_v37  ;;  %vm1366_vm11 = vweird.f32 %v1234_v37 }
 0x44f   :  { %2958 = vmatmul.msk.f32.vlgmr.msra.gmra.mxu1 %vm149_vm0, %v3897_v25  ;;  %v1373_v1 = vor.u32 1.1754944e-38, %v1372_v2  ;;  %vm1371_vm13 = vcmp.eq.f32.partialorder %v1370_v46, 8.507059e+37 }
 0x453   :  { %v3147_v61 = vpop.eup %3146 }
 0x454   :  { %v1362_v39 = vmul.f32 %v3147_v61, %v1234_v37  ;;  %vm1367_vm10 = vweird.f32 %v3147_v61 }
 0x455   :  { %vm1368_vm12 = vmor %vm1366_vm11, %vm1367_vm10 }
 0x456   :  { %v1363_v0 = vsub.f32 1.0, %v1362_v39 }
 0x457   :  { %2959 = vmatmul.msk.f32.gmra.mxu1 %vm149_vm0, %v3890_v24 }
 0x458   :  { %v1364_v40 = vmul.f32 %v3147_v61, %v1363_v0 }
 0x459   :  { %v1237_v58 = vpop.xlane.xlu0 %1236 }
 0x45a   :  { %v1365_v55 = vadd.f32 %v3147_v61, %v1364_v40  ;;  %3148 = vrcp.f32 %v1237_v58  ;;  %v1387_v5 = vand.u32 2147483648, %v1237_v58  ;;  %v1385_v20 = vand.u32 2147483647, %v1237_v58 }
 0x45b   :  { %vm1381_vm15 = vweird.f32 %v1237_v58 }
 0x45c   :  { %v1369_v6 = vsel %vm1368_vm12, %v3147_v61, %v1365_v55  ;;  %vm1386_vm3 = vcmp.eq.f32.partialorder %v1385_v20, 8.507059e+37 }
 0x45d   :  { %v1374_v26 = vsel %vm1371_vm13, %v1373_v1, %v1369_v6 }
 0x45e   :  { %v1375_v53 = vmul.f32 %v4007_v4, %v1374_v26  ;;  %v1388_v4 = vor.u32 1.1754944e-38, %v1387_v5 }
 0x45f   :  { %2960 = vmatmul.msk.f32.gmra.mxu1 %vm149_vm0, %v4070_v32 }
 0x460   :  { %v3149_v30 = vpop.eup %3148  ;;  %2955 = vmatmul.msk.f32.vlgmr.msra.gmra.mxu2 %vm1141_vm7, %v1375_v53 }
 0x461   :  { %v1377_v3 = vmul.f32 %v3149_v30, %v1237_v58  ;;  %2975 = vmatpush.xpose.msk.msra.mxu2 %vm149_vm0, %v4060_v27  ;;  %vm1382_vm14 = vweird.f32 %v3149_v30  ;;  %v1240_v35 = vpop.xlane.xlu0 %1239 }
 0x462   :  { %vm1383_vm2 = vmor %vm1381_vm15, %vm1382_vm14  ;;  %3150 = vrcp.f32 %v1240_v35  ;;  %v1402_v47 = vand.u32 2147483648, %v1240_v35  ;;  %vm1396_vm11 = vweird.f32 %v1240_v35  ;;  %v1400_v50 = vand.u32 2147483647, %v1240_v35 }
 0x463   :  { %v1378_v10 = vsub.f32 1.0, %v1377_v3 }
 0x464   :  { %v4084_v15 = vpop.permute.xlu1 %1669  ;;  %v1403_v54 = vor.u32 1.1754944e-38, %v1402_v47  ;;  %vm1401_vm13 = vcmp.eq.f32.partialorder %v1400_v50, 8.507059e+37 }
 0x465   :  { %v1379_v11 = vmul.f32 %v3149_v30, %v1378_v10 }
 0x467   :  { %v1380_v14 = vadd.f32 %v3149_v30, %v1379_v11  ;;  %2961 = vmatmul.msk.f32.gmra.mxu1 %vm149_vm0, %v4060_v27 }
 0x468   :  { %2970 = vmatmul.msk.f32.vlgmr.msrb.gmra.mxu2 %vm149_vm0, %v4078_v51  ;;  %v3151_v9 = vpop.eup %3150 }
 0x469   :  { %v1384_v31 = vsel %vm1383_vm2, %v3149_v30, %v1380_v14  ;;  %vm1397_vm9 = vweird.f32 %v3151_v9 }
 0x46a   :  { %v1389_v16 = vsel %vm1386_vm3, %v1388_v4, %v1384_v31  ;;  %vm1398_vm12 = vmor %vm1396_vm11, %vm1397_vm9 }
 0x46b   :  { %v1390_v17 = vmul.f32 %v4014_v12, %v1389_v16  ;;  %v1392_v12 = vmul.f32 %v3151_v9, %v1240_v35 }
 0x46c   :  { %v4094_v18 = vpop.permute.xlu1 %1675 }
 0x46d   :  { %2956 = vmatmul.msk.f32.vlgmr.msra.gmra.mxu3 %vm1141_vm7, %v1390_v17  ;;  %v1393_v41 = vsub.f32 1.0, %v1392_v12 }
 0x46e   :  { %2977 = vmatpush.xpose.msk.msra.mxu3 %vm149_vm0, %v4066_v49 }
 0x46f   :  { %2962 = vmatmul.msk.f32.gmra.mxu1 %vm149_vm0, %v4066_v49  ;;  %v1394_v33 = vmul.f32 %v3151_v9, %v1393_v41 }
 0x470   :  { %2976 = vmatmul.msk.f32.vlgmr.msra.gmra.mxu2 %vm149_vm0, %v4078_v51 }
 0x471   :  { %v1395_v21 = vadd.f32 %v3151_v9, %v1394_v33 }
 0x474   :  { %v1228_v19 = vpop.xlane.xlu2 %1227  ;;  %v4096_v22 = vpop.permute.xlu0 %1673 }
 0x475   :  { %3152 = vrcp.f32 %v1228_v19  ;;  %2972 = vmatmul.msk.f32.vlgmr.msrb.gmra.mxu3 %vm149_vm0, %v4078_v51  ;;  %v4106_v42 = vpop.permute.xlu1 %1679  ;;  %v1342_v28 = vand.u32 2147483648, %v1228_v19  ;;  %v1340_v38 = vand.u32 2147483647, %v1228_v19  ;;  %vm1336_vm5 = vweird.f32 %v1228_v19 }
 0x476   :  { %2983 = vmatpush.xpose.msk.msrb.mxu3 %vm149_vm0, %v4096_v22 }
 0x477   :  { %2963 = vmatmul.msk.f32.gmra.mxu1 %vm149_vm0, %v4084_v15  ;;  %v1343_v45 = vor.u32 1.1754944e-38, %v1342_v28  ;;  %vm1341_vm10 = vcmp.eq.f32.partialorder %v1340_v38, 8.507059e+37 }
 0x47b   :  { %v3153_v63 = vpop.eup %3152 }
 0x47c   :  { %v1332_v60 = vmul.f32 %v3153_v63, %v1228_v19  ;;  %v4104_v59 = vpop.permute.xlu2 %1671  ;;  %v4108_v36 = vpop.permute.xlu0 %1677  ;;  %vm1337_vm4 = vweird.f32 %v3153_v63 }
 0x47d   :  { %2978 = vmatmul.msk.f32.vlgmr.msra.gmra.mxu3 %vm149_vm0, %v4078_v51  ;;  %2981 = vmatpush.xpose.msk.msrb.mxu2 %vm149_vm0, %v4104_v59  ;;  %vm1338_vm8 = vmor %vm1336_vm5, %vm1337_vm4 }
 0x47e   :  { %v1333_v13 = vsub.f32 1.0, %v1332_v60  ;;  %2989 = vmatpush.xpose.msk.msra.mxu3 %vm149_vm0, %v4106_v42 }
 0x47f   :  { %2964 = vmatmul.msk.f32.gmra.mxu1 %vm149_vm0, %v4104_v59 }
 0x480   :  { %v1334_v34 = vmul.f32 %v3153_v63, %v1333_v13  ;;  %2982 = vmatmul.msk.f32.vlgmr.msrb.gmra.mxu2 %vm149_vm0, %v4078_v51 }
 0x481   :  { %2987 = vmatpush.xpose.msk.msra.mxu2 %vm149_vm0, %v4108_v36 }
 0x482   :  { %v1335_v43 = vadd.f32 %v3153_v63, %v1334_v34 }
 0x484   :  { %v1339_v7 = vsel %vm1338_vm8, %v3153_v63, %v1335_v43 }
 0x485   :  { %2413 = vmatpush.msrb.mxu2 %v3890_v24  ;;  %v1344_v48 = vsel %vm1341_vm10, %v1343_v45, %v1339_v7  ;;  %2984 = vmatmul.msk.f32.vlgmr.msrb.gmra.mxu3 %vm149_vm0, %v4078_v51  ;;  %v1399_v24 = vsel %vm1398_vm12, %v3151_v9, %v1395_v21 }
 0x486   :  { %2437 = vmatpush.msrb.mxu3 %v4070_v32  ;;  %v1345_v52 = vmul.f32 %v4027_v62, %v1344_v48  ;;  %v1404_v44 = vsel %vm1401_vm13, %v1403_v54, %v1399_v24 }
 0x487   :  { %2965 = vmatmul.msk.f32.gmra.mxu1 %vm149_vm0, %v4096_v22  ;;  %v1405_v62 = vmul.f32 %v4018_v8, %v1404_v44 }
 0x488   :  { %2953 = vmatmul.msk.f32.vlgmr.msra.gmra.mxu0 %vm1141_vm7, %v1345_v52  ;;  %2988 = vmatmul.msk.f32.vlgmr.msra.gmra.mxu2 %vm149_vm0, %v4078_v51 }
 0x489   :  { %2973 = vmatpush.xpose.msk.msra.mxu0 %vm149_vm0, %v4070_v32  ;;  %2485 = vmatpush.msra.mxu2 %v4066_v49 }
 0x48d   :  { %2990 = vmatmul.msk.f32.vlgmr.msra.gmra.mxu3 %vm149_vm0, %v4078_v51 }
 0x48e   :  { %2509 = vmatpush.msra.mxu3 %v4084_v15 }
 0x48f   :  { %2966 = vmatmul.msk.f32.gmra.mxu1 %vm149_vm0, %v4094_v18 }
 0x490   :  { %2957 = vmatmul.msk.f32.vlgmr.msrb.gmra.mxu0 %vm1141_vm7, %v1405_v62 }
 0x491   :  { %2979 = vmatpush.xpose.msk.msrb.mxu0 %vm149_vm0, %v4084_v15 }
 0x497   :  { %2967 = vmatmul.msk.f32.gmra.mxu1 %vm149_vm0, %v4108_v36 }
 0x498   :  { %2974 = vmatmul.msk.f32.vlgmr.msra.gmra.mxu0 %vm149_vm0, %v4078_v51 }
 0x499   :  { %2985 = vmatpush.xpose.msk.msra.mxu0 %vm149_vm0, %v4094_v18 }
 0x49f   :  { %2968 = vmatmul.msk.f32.gmra.mxu1 %vm149_vm0, %v4106_v42 }
 0x4a0   :  { %2980 = vmatmul.msk.f32.vlgmr.msrb.gmra.mxu0 %vm149_vm0, %v4078_v51  ;;  %v4166_v40 = vpop.f32.mrf.mxu2 }
 0x4a1   :  { %2389 = vmatpush.msrb.mxu0 %v3897_v25 }
 0x4a2   :  { %v4168_v46 = vpop.f32.mrf.mxu3 }
 0x4a8   :  { %2986 = vmatmul.msk.f32.vlgmr.msra.gmra.mxu0 %vm149_vm0, %v4078_v51 }
 0x4a9   :  { %2461 = vmatpush.msra.mxu0 %v4060_v27  ;;  %v4162_v27 = vpop.f32.mrf.mxu0 }
 0x4ad   :  { %v4158_v8 = vpop.f32.mrf.mxu1 }
 0x4b2   :  { %v4170_v58 = vpop.f32.mrf.mxu2 }
 0x4c2   :  { %v4174_v1 = vpop.f32.mrf.mxu3 }
 0x4c4   :  { %v4160_v23 = vpop.f32.mrf.mxu1 }
 0x4cc   :  { %v1728_v56 = vpop.f32.mrf.mxu1 }
 0x4cd   :  { %1987 = vperm.xlu0 %3036, %v1728_v56  }
 0x4d4   :  { %v1731_v57 = vpop.f32.mrf.mxu1 }
 0x4d5   :  { %1992 = vperm.xlu1 %3037, %v1731_v57  }
 0x4dc   :  { %v1734_v37 = vpop.f32.mrf.mxu1 }
 0x4dd   :  { %1997 = vperm.xlu2 %3038, %v1734_v37  }
 0x4e3   :  { %v4176_v6 = vpop.f32.mrf.mxu2 }
 0x4e4   :  { %v1737_v49 = vpop.f32.mrf.mxu1 }
 0x4e5   :  { %2002 = vperm.xlu0 %3036, %v1737_v49  }
 0x4eb   :  { %v1782_v10 = vpop.f32.mrf.mxu2 }
 0x4ec   :  { %v1740_v61 = vpop.f32.mrf.mxu1  ;;  %v2040_v11 = vperm.slane %v1782_v10, 0 }
 0x4ed   :  { %2007 = vperm.xlu1 %3037, %v1740_v61  }
 0x4f0   :  { %v4178_v3 = vpop.f32.mrf.mxu3 }
 0x4f3   :  { %v1842_v34 = vpop.f32.mrf.mxu2 }
 0x4f4   :  { %v1743_v25 = vpop.f32.mrf.mxu1  ;;  %v2043_v38 = vperm.slane %v1842_v34, 0 }
 0x4f5   :  { %2012 = vperm.xlu2 %3038, %v1743_v25  }
 0x4f8   :  { %v1802_v15 = vpop.f32.mrf.mxu3 }
 0x4f9   :  { %v2041_v17 = vperm.slane %v1802_v15, 0 }
 0x4fc   :  { %v1746_v39 = vpop.f32.mrf.mxu1 }
 0x4fd   :  { %2017 = vperm.xlu1 %3037, %v1746_v39  }
 0x500   :  { %v1862_v47 = vpop.f32.mrf.mxu3 }
 0x501   :  { %v2044_v52 = vperm.slane %v1862_v47, 0 }
 0x504   :  { %v1749_v0 = vpop.f32.mrf.mxu1 }
 0x505   :  { %2022 = vperm.xlu1 %3037, %v1749_v0   ;;  %v4164_v2 = vpop.f32.mrf.mxu0 }
 0x50c   :  { %v1752_v28 = vpop.f32.mrf.mxu1 }
 0x50d   :  { %v4172_v55 = vpop.f32.mrf.mxu0 }
 0x514   :  { %v1755_v45 = vpop.f32.mrf.mxu1 }
 0x515   :  { %v1822_v26 = vpop.f32.mrf.mxu0 }
 0x516   :  { %v2042_v32 = vperm.slane %v1822_v26, 0 }
 0x51c   :  { %v1758_v49 = vpop.f32.mrf.mxu1 }
 0x51d   :  { %v1882_v7 = vpop.f32.mrf.mxu0 }
 0x51e   :  { %v2045_v50 = vperm.slane %v1882_v7, 0 }
 0x537   :  { %v1998_v53 = vpop.permute.xlu2 %1997 }
 0x538   :  { %v2053_v30 = vadd.f32 %v2042_v32, %v1998_v53 }
 0x53a   :  { %v2075_v5 = vmul.f32 0.2, %v2053_v30  ;;  %vm2064_vm14 = vcmp.ge.f32.partialorder %v2053_v30, 0.0 }
 0x53c   :  { %v2086_v20 = vsel %vm2064_vm14, %v2053_v30, %v2075_v5  ;;  %v1922_v5 = vpop.f32.mrf.mxu3 }
 0x53d   :  { %v4182_v51 = vsel %vm1127_vm6, %v2086_v20, -1e+30  ;;  %v1902_v20 = vpop.f32.mrf.mxu2 }
 0x53e   :  { %v2112_v14 = vsel %vm1141_vm7, %v4182_v51, -inf }
 0x53f   :  { %2113 = vmax.xlane.f32.xlu1 %v2112_v14  ;;  %v1988_v4 = vpop.permute.xlu0 %1987 }
 0x540   :  { %v2051_v31 = vadd.f32 %v2040_v11, %v1988_v4  ;;  %v2047_v11 = vperm.slane %v1922_v5, 0 }
 0x542   :  { %v2073_v16 = vmul.f32 0.2, %v2051_v31  ;;  %vm2062_vm15 = vcmp.ge.f32.partialorder %v2051_v31, 0.0 }
 0x544   :  { %v2084_v35 = vsel %vm2062_vm15, %v2051_v31, %v2073_v16  ;;  %v2046_v31 = vperm.slane %v1902_v20, 0 }
 0x545   :  { %v4188_v19 = vsel %vm1127_vm6, %v2084_v35, -1e+30 }
 0x546   :  { %v2106_v9 = vsel %vm1141_vm7, %v4188_v19, -inf }
 0x547   :  { %v1993_v12 = vpop.permute.xlu1 %1992  ;;  %2107 = vmax.xlane.f32.xlu0 %v2106_v9 }
 0x548   :  { %v2052_v63 = vadd.f32 %v2041_v17, %v1993_v12 }
 0x54a   :  { %v2074_v41 = vmul.f32 0.2, %v2052_v63  ;;  %vm2063_vm2 = vcmp.ge.f32.partialorder %v2052_v63, 0.0 }
 0x54c   :  { %v2085_v60 = vsel %vm2063_vm2, %v2052_v63, %v2074_v41 }
 0x54d   :  { %v4194_v13 = vsel %vm1127_vm6, %v2085_v60, -1e+30 }
 0x54e   :  { %v2109_v33 = vsel %vm1141_vm7, %v4194_v13, -inf }
 0x54f   :  { %2110 = vmax.xlane.f32.xlu2 %v2109_v33  ;;  %v2013_v54 = vpop.permute.xlu2 %2012 }
 0x550   :  { %v2056_v57 = vadd.f32 %v2045_v50, %v2013_v54 }
 0x552   :  { %v2078_v25 = vmul.f32 0.2, %v2056_v57  ;;  %vm2067_vm5 = vcmp.ge.f32.partialorder %v2056_v57, 0.0 }
 0x554   :  { %v2089_v32 = vsel %vm2067_vm5, %v2056_v57, %v2078_v25 }
 0x555   :  { %v4212_v53 = vsel %vm1127_vm6, %v2089_v32, -1e+30 }
 0x556   :  { %v2121_v30 = vsel %vm1141_vm7, %v4212_v53, -inf }
 0x557   :  { %v2003_v43 = vpop.permute.xlu0 %2002 }
 0x558   :  { %v2054_v21 = vadd.f32 %v2043_v38, %v2003_v43 }
 0x55a   :  { %v2076_v48 = vmul.f32 0.2, %v2054_v21  ;;  %vm2065_vm3 = vcmp.ge.f32.partialorder %v2054_v21, 0.0 }
 0x55b   :  { %2027 = vperm.xlu0 %3036, %v1752_v28  }
 0x55c   :  { %v2087_v24 = vsel %vm2065_vm3, %v2054_v21, %v2076_v48 }
 0x55d   :  { %v4200_v44 = vsel %vm1127_vm6, %v2087_v24, -1e+30  ;;  %v1982_v24 = vpop.f32.mrf.mxu3 }
 0x55e   :  { %v2115_v62 = vsel %vm1141_vm7, %v4200_v44, -inf }
 0x55f   :  { %v2008_v56 = vpop.permute.xlu1 %2007  ;;  %2116 = vmax.xlane.f32.xlu2 %v2115_v62 }
 0x560   :  { %v2055_v37 = vadd.f32 %v2044_v52, %v2008_v56  ;;  %v2050_v56 = vperm.slane %v1982_v24, 0 }
 0x562   :  { %v2077_v61 = vmul.f32 0.2, %v2055_v37  ;;  %vm2066_vm4 = vcmp.ge.f32.partialorder %v2055_v37, 0.0 }
 0x563   :  { %2037 = vperm.xlu0 %3036, %v1758_v49  }
 0x564   :  { %v2088_v39 = vsel %vm2066_vm4, %v2055_v37, %v2077_v61 }
 0x565   :  { %v4206_v0 = vsel %vm1127_vm6, %v2088_v39, -1e+30 }
 0x566   :  { %v2118_v26 = vsel %vm1141_vm7, %v4206_v0, -inf }
 0x567   :  { %2119 = vmax.xlane.f32.xlu1 %v2118_v26  ;;  %v1962_v26 = vpop.f32.mrf.mxu2 }
 0x56f   :  { %v2018_v10 = vpop.permute.xlu1 %2017  ;;  %2122 = vmax.xlane.f32.xlu1 %v2121_v30 }
 0x570   :  { %v2057_v35 = vadd.f32 %v2046_v31, %v2018_v10  ;;  %v2049_v10 = vperm.slane %v1962_v26, 0 }
 0x572   :  { %v2079_v12 = vmul.f32 0.2, %v2057_v35  ;;  %vm2068_vm9 = vcmp.ge.f32.partialorder %v2057_v35, 0.0 }
 0x574   :  { %v2090_v63 = vsel %vm2068_vm9, %v2057_v35, %v2079_v12 }
 0x575   :  { %v4224_v41 = vsel %vm1127_vm6, %v2090_v63, -1e+30 }
 0x576   :  { %v2124_v60 = vsel %vm1141_vm7, %v4224_v41, -inf }
 0x577   :  { %v2023_v14 = vpop.permute.xlu1 %2022  ;;  %2032 = vperm.xlu2 %3038, %v1755_v45   ;;  %v1942_v45 = vpop.f32.mrf.mxu0 }
 0x578   :  { %v2058_v4 = vadd.f32 %v2047_v11, %v2023_v14  ;;  %v2048_v7 = vperm.slane %v1942_v45, 0 }
 0x57a   :  { %v2080_v15 = vmul.f32 0.2, %v2058_v4  ;;  %vm2069_vm8 = vcmp.ge.f32.partialorder %v2058_v4, 0.0 }
 0x57c   :  { %v2091_v16 = vsel %vm2069_vm8, %v2058_v4, %v2080_v15 }
 0x57d   :  { %v4218_v17 = vsel %vm1127_vm6, %v2091_v16, -1e+30 }
 0x57e   :  { %v2127_v9 = vsel %vm1141_vm7, %v4218_v17, -inf }
 0x57f   :  { %2128 = vmax.xlane.f32.xlu1 %v2127_v9 }
 0x58d   :  { %2125 = vmax.xlane.f32.xlu0 %v2124_v60 }
 0x5b2   :  { %v2114_v54 = vpop.xlane.xlu1 %2113 }
 0x5b3   :  { %v2141_v37 = vsub.f32 %v4182_v51, %v2114_v54 }
 0x5b5   :  { %v2154_v39 = vmul.f32 1.442695, %v2141_v37 }
 0x5ba   :  { %v2108_v28 = vpop.xlane.xlu0 %2107 }
 0x5bb   :  { %v2139_v33 = vsub.f32 %v4188_v19, %v2108_v28 }
 0x5bd   :  { %v2150_v34 = vmul.f32 1.442695, %v2139_v33 }
 0x5bf   :  { %3154 = vpow2.f32 %v2150_v34 }
 0x5c2   :  { %v2111_v21 = vpop.xlane.xlu2 %2110 }
 0x5c3   :  { %v2140_v47 = vsub.f32 %v4194_v13, %v2111_v21 }
 0x5c5   :  { %v4229_v38 = vpop.eup %3154  ;;  %v2152_v52 = vmul.f32 1.442695, %v2140_v47 }
 0x5c6   :  { %v2172_v43 = vsel %vm1141_vm7, %v4229_v38, 0.0 }
 0x5c7   :  { %2173 = vadd.xlane.f32.xlu2 %v2172_v43  ;;  %3156 = vpow2.f32 %v2152_v52 }
 0x5c8   :  { %3158 = vpow2.f32 %v2154_v39 }
 0x5cd   :  { %v2028_v48 = vpop.permute.xlu0 %2027  ;;  %v4241_v30 = vpop.eup %3156 }
 0x5ce   :  { %v2059_v50 = vadd.f32 %v2048_v7, %v2028_v48  ;;  %v2175_v4 = vsel %vm1141_vm7, %v4241_v30, 0.0  ;;  %v4252_v35 = vpop.eup %3158 }
 0x5cf   :  { %v2178_v60 = vsel %vm1141_vm7, %v4252_v35, 0.0 }
 0x5d0   :  { %v2081_v62 = vmul.f32 0.2, %v2059_v50  ;;  %vm2070_vm10 = vcmp.ge.f32.partialorder %v2059_v50, 0.0 }
 0x5d2   :  { %v2117_v19 = vpop.xlane.xlu2 %2116  ;;  %v2092_v57 = vsel %vm2070_vm10, %v2059_v50, %v2081_v62 }
 0x5d3   :  { %v4237_v49 = vsel %vm1127_vm6, %v2092_v57, -1e+30  ;;  %v2142_v12 = vsub.f32 %v4200_v44, %v2117_v19 }
 0x5d4   :  { %v2130_v13 = vsel %vm1141_vm7, %v4237_v49, -inf }
 0x5d5   :  { %2131 = vmax.xlane.f32.xlu1 %v2130_v13  ;;  %v2038_v61 = vpop.permute.xlu0 %2037  ;;  %v2156_v45 = vmul.f32 1.442695, %v2142_v12 }
 0x5d6   :  { %v2061_v25 = vadd.f32 %v2050_v56, %v2038_v61 }
 0x5d8   :  { %v2083_v32 = vmul.f32 0.2, %v2061_v25  ;;  %vm2072_vm11 = vcmp.ge.f32.partialorder %v2061_v25, 0.0 }
 0x5da   :  { %v2120_v5 = vpop.xlane.xlu1 %2119  ;;  %v2094_v51 = vsel %vm2072_vm11, %v2061_v25, %v2083_v32  ;;  %v2033_v20 = vpop.permute.xlu2 %2032 }
 0x5db   :  { %v2143_v11 = vsub.f32 %v4206_v0, %v2120_v5  ;;  %v4246_v14 = vsel %vm1127_vm6, %v2094_v51, -1e+30  ;;  %v2060_v16 = vadd.f32 %v2049_v10, %v2033_v20 }
 0x5dc   :  { %v2136_v31 = vsel %vm1141_vm7, %v4246_v14, -inf }
 0x5dd   :  { %v2158_v15 = vmul.f32 1.442695, %v2143_v11  ;;  %2176 = vadd.xlane.f32.xlu1 %v2175_v4  ;;  %2137 = vmax.xlane.f32.xlu0 %v2136_v31  ;;  %v2082_v9 = vmul.f32 0.2, %v2060_v16  ;;  %vm2071_vm12 = vcmp.ge.f32.partialorder %v2060_v16, 0.0 }
 0x5df   :  { %3160 = vpow2.f32 %v2158_v15  ;;  %v2093_v43 = vsel %vm2071_vm12, %v2060_v16, %v2082_v9 }
 0x5e0   :  { %v4264_v44 = vsel %vm1127_vm6, %v2093_v43, -1e+30 }
 0x5e2   :  { %v2123_v0 = vpop.xlane.xlu1 %2122 }
 0x5e3   :  { %v2144_v63 = vsub.f32 %v4212_v53, %v2123_v0  ;;  %v2133_v53 = vsel %vm1141_vm7, %v4264_v44, -inf }
 0x5e5   :  { %v4258_v28 = vpop.eup %3160  ;;  %v2160_v33 = vmul.f32 1.442695, %v2144_v63  ;;  %2179 = vadd.xlane.f32.xlu1 %v2178_v60 }
 0x5e6   :  { %v2184_v34 = vsel %vm1141_vm7, %v4258_v28, 0.0 }
 0x5e7   :  { %3162 = vpow2.f32 %v2160_v33  ;;  %2185 = vadd.xlane.f32.xlu0 %v2184_v34 }
 0x5e8   :  { %3164 = vpow2.f32 %v2156_v45 }
 0x5ed   :  { %v4268_v21 = vpop.eup %3162  ;;  %2134 = vmax.xlane.f32.xlu1 %v2133_v53 }
 0x5ee   :  { %v2187_v7 = vsel %vm1141_vm7, %v4268_v21, 0.0  ;;  %v4272_v47 = vpop.eup %3164 }
 0x5ef   :  { %2188 = vadd.xlane.f32.xlu2 %v2187_v7  ;;  %v2181_v29 = vsel %vm1141_vm7, %v4272_v47, 0.0 }
 0x5f2   :  { %v2129_v48 = vpop.xlane.xlu1 %2128 }
 0x5f3   :  { %v2146_v50 = vsub.f32 %v4218_v17, %v2129_v48 }
 0x5f5   :  { %v2164_v52 = vmul.f32 1.442695, %v2146_v50  ;;  %2182 = vadd.xlane.f32.xlu1 %v2181_v29 }
 0x5f7   :  { %3166 = vpow2.f32 %v2164_v52 }
 0x5fd   :  { %v4277_v24 = vpop.eup %3166 }
 0x5fe   :  { %v2193_v54 = vsel %vm1141_vm7, %v4277_v24, 0.0 }
 0x5ff   :  { %2194 = vadd.xlane.f32.xlu0 %v2193_v54 }
 0x600   :  { %v2126_v62 = vpop.xlane.xlu0 %2125 }
 0x601   :  { %v2145_v19 = vsub.f32 %v4224_v41, %v2126_v62 }
 0x603   :  { %v2162_v56 = vmul.f32 1.442695, %v2145_v19 }
 0x605   :  { %3168 = vpow2.f32 %v2162_v56 }
 0x60b   :  { %v4282_v57 = vpop.eup %3168 }
 0x60c   :  { %v2190_v17 = vsel %vm1141_vm7, %v4282_v57, 0.0 }
 0x60d   :  { %2191 = vadd.xlane.f32.xlu1 %v2190_v17 }
 0x63a   :  { %v2174_v37 = vpop.xlane.xlu2 %2173 }
 0x63b   :  { %3170 = vrcp.f32 %v2174_v37  ;;  %v2216_v39 = vand.u32 2147483648, %v2174_v37  ;;  %v2214_v32 = vand.u32 2147483647, %v2174_v37  ;;  %vm2210_vm13 = vweird.f32 %v2174_v37 }
 0x63d   :  { %v2217_v5 = vor.u32 1.1754944e-38, %v2216_v39  ;;  %vm2215_vm15 = vcmp.eq.f32.partialorder %v2214_v32, 8.507059e+37 }
 0x641   :  { %v3171_v13 = vpop.eup %3170 }
 0x642   :  { %v2206_v61 = vmul.f32 %v3171_v13, %v2174_v37  ;;  %vm2211_vm6 = vweird.f32 %v3171_v13 }
 0x643   :  { %vm2212_vm14 = vmor %vm2210_vm13, %vm2211_vm6 }
 0x644   :  { %v2207_v25 = vsub.f32 1.0, %v2206_v61 }
 0x646   :  { %v2208_v26 = vmul.f32 %v3171_v13, %v2207_v25 }
 0x648   :  { %v2209_v10 = vadd.f32 %v3171_v13, %v2208_v26  ;;  %v2132_v41 = vpop.xlane.xlu1 %2131 }
 0x649   :  { %v2147_v51 = vsub.f32 %v4237_v49, %v2132_v41 }
 0x64a   :  { %v2213_v11 = vsel %vm2212_vm14, %v3171_v13, %v2209_v10 }
 0x64b   :  { %v2218_v20 = vsel %vm2215_vm15, %v2217_v5, %v2213_v11  ;;  %v2166_v4 = vmul.f32 1.442695, %v2147_v51 }
 0x64c   :  { %v2219_v31 = vmul.f32 %v4229_v38, %v2218_v20 }
 0x64d   :  { %3172 = vpow2.f32 %v2166_v4 }
 0x64e   :  { %2991 = vmatmul.msk.f32.vlgmr.msrb.gmra.mxu0 %vm1141_vm7, %v2219_v31 }
 0x64f   :  { %2533 = vmatpush.msrb.mxu0 %v4104_v59 }
 0x650   :  { %v2177_v15 = vpop.xlane.xlu1 %2176  ;;  %v2138_v16 = vpop.xlane.xlu0 %2137 }
 0x651   :  { %3174 = vrcp.f32 %v2177_v15  ;;  %v2149_v9 = vsub.f32 %v4246_v14, %v2138_v16  ;;  %v2231_v59 = vand.u32 2147483648, %v2177_v15  ;;  %v2229_v14 = vand.u32 2147483647, %v2177_v15 }
 0x652   :  { %vm2225_vm3 = vweird.f32 %v2177_v15 }
 0x653   :  { %v4291_v0 = vpop.eup %3172  ;;  %v2170_v12 = vmul.f32 1.442695, %v2149_v9  ;;  %v2232_v50 = vor.u32 1.1754944e-38, %v2231_v59  ;;  %vm2230_vm5 = vcmp.eq.f32.partialorder %v2229_v14, 8.507059e+37 }
 0x654   :  { %v2196_v49 = vsel %vm1141_vm7, %v4291_v0, 0.0 }
 0x655   :  { %2197 = vadd.xlane.f32.xlu2 %v2196_v49  ;;  %3176 = vpow2.f32 %v2170_v12 }
 0x657   :  { %v3175_v63 = vpop.eup %3174 }
 0x658   :  { %v2221_v38 = vmul.f32 %v3175_v63, %v2177_v15  ;;  %v2180_v60 = vpop.xlane.xlu1 %2179  ;;  %vm2226_vm2 = vweird.f32 %v3175_v63 }
 0x659   :  { %3178 = vrcp.f32 %v2180_v60  ;;  %vm2227_vm4 = vmor %vm2225_vm3, %vm2226_vm2  ;;  %v2246_v25 = vand.u32 2147483648, %v2180_v60  ;;  %v2244_v32 = vand.u32 2147483647, %v2180_v60  ;;  %vm2240_vm9 = vweird.f32 %v2180_v60 }
 0x65a   :  { %v2222_v33 = vsub.f32 1.0, %v2221_v38  ;;  %v2186_v34 = vpop.xlane.xlu0 %2185 }
 0x65b   :  { %3180 = vrcp.f32 %v2186_v34  ;;  %v4295_v43 = vpop.eup %3176  ;;  %v2276_v41 = vand.u32 2147483648, %v2186_v34  ;;  %v2274_v51 = vand.u32 2147483647, %v2186_v34  ;;  %vm2245_vm12 = vcmp.eq.f32.partialorder %v2244_v32, 8.507059e+37 }
 0x65c   :  { %v2223_v45 = vmul.f32 %v3175_v63, %v2222_v33  ;;  %v2202_v53 = vsel %vm1141_vm7, %v4295_v43, 0.0  ;;  %vm2270_vm6 = vweird.f32 %v2186_v34 }
 0x65d   :  { %2203 = vadd.xlane.f32.xlu0 %v2202_v53  ;;  %v2277_v16 = vor.u32 1.1754944e-38, %v2276_v41  ;;  %vm2275_vm14 = vcmp.eq.f32.partialorder %v2274_v51, 8.507059e+37 }
 0x65e   :  { %v2224_v7 = vadd.f32 %v3175_v63, %v2223_v45 }
 0x65f   :  { %v3179_v48 = vpop.eup %3178 }
 0x660   :  { %v2228_v29 = vsel %vm2227_vm4, %v3175_v63, %v2224_v7  ;;  %v2236_v52 = vmul.f32 %v3179_v48, %v2180_v60  ;;  %v2135_v54 = vpop.xlane.xlu1 %2134  ;;  %vm2241_vm8 = vweird.f32 %v3179_v48 }
 0x661   :  { %v3181_v62 = vpop.eup %3180  ;;  %v2233_v19 = vsel %vm2230_vm5, %v2232_v50, %v2228_v29  ;;  %v2148_v56 = vsub.f32 %v4264_v44, %v2135_v54  ;;  %vm2242_vm11 = vmor %vm2240_vm9, %vm2241_vm8 }
 0x662   :  { %v2237_v17 = vsub.f32 1.0, %v2236_v52  ;;  %v2266_v37 = vmul.f32 %v3181_v62, %v2186_v34  ;;  %v2189_v13 = vpop.xlane.xlu2 %2188  ;;  %v2234_v61 = vmul.f32 %v4241_v30, %v2233_v19  ;;  %vm2271_vm10 = vweird.f32 %v3181_v62 }
 0x663   :  { %v2168_v39 = vmul.f32 1.442695, %v2148_v56  ;;  %3182 = vrcp.f32 %v2189_v13  ;;  %v2247_v30 = vor.u32 1.1754944e-38, %v2246_v25  ;;  %vm2272_vm13 = vmor %vm2270_vm6, %vm2271_vm10  ;;  %v2291_v34 = vand.u32 2147483648, %v2189_v13 }
 0x664   :  { %v2238_v26 = vmul.f32 %v3179_v48, %v2237_v17  ;;  %v2267_v10 = vsub.f32 1.0, %v2266_v37  ;;  %2992 = vmatmul.msk.f32.vlgmr.msrb.gmra.mxu2 %vm1141_vm7, %v2234_v61  ;;  %v2289_v45 = vand.u32 2147483647, %v2189_v13  ;;  %vm2285_vm2 = vweird.f32 %v2189_v13 }
 0x665   :  { %3184 = vpow2.f32 %v2168_v39  ;;  %2557 = vmatpush.msrb.mxu2 %v4096_v22  ;;  %v2292_v53 = vor.u32 1.1754944e-38, %v2291_v34 }
 0x666   :  { %v2239_v44 = vadd.f32 %v3179_v48, %v2238_v26  ;;  %v2268_v5 = vmul.f32 %v3181_v62, %v2267_v10  ;;  %vm2290_vm4 = vcmp.eq.f32.partialorder %v2289_v45, 8.507059e+37 }
 0x668   :  { %v2243_v11 = vsel %vm2242_vm11, %v3179_v48, %v2239_v44  ;;  %v2269_v20 = vadd.f32 %v3181_v62, %v2268_v5  ;;  %v2183_v4 = vpop.xlane.xlu1 %2182 }
 0x669   :  { %v3183_v31 = vpop.eup %3182  ;;  %v2248_v15 = vsel %vm2245_vm12, %v2247_v30, %v2243_v11  ;;  %3186 = vrcp.f32 %v2183_v4  ;;  %v2261_v52 = vand.u32 2147483648, %v2183_v4  ;;  %vm2255_vm8 = vweird.f32 %v2183_v4 }
 0x66a   :  { %v2273_v9 = vsel %vm2272_vm13, %v3181_v62, %v2269_v20  ;;  %v2281_v12 = vmul.f32 %v3183_v31, %v2189_v13  ;;  %v2249_v63 = vmul.f32 %v4252_v35, %v2248_v15  ;;  %vm2286_vm15 = vweird.f32 %v3183_v31 }
 0x66b   :  { %v4303_v22 = vpop.eup %3184  ;;  %v2278_v49 = vsel %vm2275_vm14, %v2277_v16, %v2273_v9  ;;  %vm2287_vm3 = vmor %vm2285_vm2, %vm2286_vm15 }
 0x66c   :  { %v2279_v38 = vmul.f32 %v4258_v28, %v2278_v49  ;;  %v2282_v60 = vsub.f32 1.0, %v2281_v12  ;;  %v2199_v33 = vsel %vm1141_vm7, %v4303_v22, 0.0  ;;  %2993 = vmatmul.msk.f32.vlgmr.msrb.gmra.mxu3 %vm1141_vm7, %v2249_v63 }
 0x66d   :  { %2200 = vadd.xlane.f32.xlu1 %v2199_v33  ;;  %2581 = vmatpush.msrb.mxu3 %v4094_v18  ;;  %v2259_v18 = vand.u32 2147483647, %v2183_v4 }
 0x66e   :  { %v2283_v59 = vmul.f32 %v3183_v31, %v2282_v60  ;;  %2995 = vmatmul.msk.f32.vlgmr.msra.gmra.mxu2 %vm1141_vm7, %v2279_v38 }
 0x66f   :  { %v3187_v14 = vpop.eup %3186  ;;  %2629 = vmatpush.msra.mxu2 %v4106_v42  ;;  %v2262_v42 = vor.u32 1.1754944e-38, %v2261_v52  ;;  %vm2260_vm10 = vcmp.eq.f32.partialorder %v2259_v18, 8.507059e+37 }
 0x670   :  { %v2284_v35 = vadd.f32 %v3183_v31, %v2283_v59  ;;  %v2251_v28 = vmul.f32 %v3187_v14, %v2183_v4  ;;  %vm2256_vm5 = vweird.f32 %v3187_v14 }
 0x671   :  { %vm2257_vm9 = vmor %vm2255_vm8, %vm2256_vm5 }
 0x672   :  { %v2288_v7 = vsel %vm2287_vm3, %v3183_v31, %v2284_v35  ;;  %v2252_v48 = vsub.f32 1.0, %v2251_v28  ;;  %v2195_v50 = vpop.xlane.xlu0 %2194 }
 0x673   :  { %v2293_v29 = vsel %vm2290_vm4, %v2292_v53, %v2288_v7  ;;  %3188 = vrcp.f32 %v2195_v50  ;;  %v2321_v39 = vand.u32 2147483648, %v2195_v50  ;;  %v2319_v26 = vand.u32 2147483647, %v2195_v50 }
 0x674   :  { %v2253_v54 = vmul.f32 %v3187_v14, %v2252_v48  ;;  %v2294_v62 = vmul.f32 %v4268_v21, %v2293_v29  ;;  %vm2315_vm12 = vweird.f32 %v2195_v50 }
 0x675   :  { %v2322_v41 = vor.u32 1.1754944e-38, %v2321_v39  ;;  %vm2320_vm13 = vcmp.eq.f32.partialorder %v2319_v26, 8.507059e+37 }
 0x676   :  { %v2254_v19 = vadd.f32 %v3187_v14, %v2253_v54  ;;  %2996 = vmatmul.msk.f32.vlgmr.msra.gmra.mxu3 %vm1141_vm7, %v2294_v62 }
 0x678   :  { %v2258_v56 = vsel %vm2257_vm9, %v3187_v14, %v2254_v19 }
 0x679   :  { %v3189_v17 = vpop.eup %3188  ;;  %v2263_v37 = vsel %vm2260_vm10, %v2262_v42, %v2258_v56 }
 0x67a   :  { %v2264_v13 = vmul.f32 %v4272_v47, %v2263_v37  ;;  %v2311_v61 = vmul.f32 %v3189_v17, %v2195_v50  ;;  %vm2316_vm11 = vweird.f32 %v3189_v17 }
 0x67b   :  { %vm2317_vm6 = vmor %vm2315_vm12, %vm2316_vm11 }
 0x67c   :  { %v2312_v25 = vsub.f32 1.0, %v2311_v61  ;;  %2994 = vmatmul.msk.f32.vlgmr.msra.gmra.mxu0 %vm1141_vm7, %v2264_v13 }
 0x67d   :  { %2605 = vmatpush.msra.mxu0 %v4108_v36 }
 0x67e   :  { %v2313_v21 = vmul.f32 %v3189_v17, %v2312_v25 }
 0x680   :  { %v2314_v32 = vadd.f32 %v3189_v17, %v2313_v21  ;;  %v2192_v10 = vpop.xlane.xlu1 %2191 }
 0x681   :  { %3190 = vrcp.f32 %v2192_v10  ;;  %v2306_v36 = vand.u32 2147483648, %v2192_v10  ;;  %v2304_v4 = vand.u32 2147483647, %v2192_v10  ;;  %vm2300_vm15 = vweird.f32 %v2192_v10 }
 0x682   :  { %v2318_v44 = vsel %vm2317_vm6, %v3189_v17, %v2314_v32 }
 0x683   :  { %v2323_v5 = vsel %vm2320_vm13, %v2322_v41, %v2318_v44  ;;  %v2307_v15 = vor.u32 1.1754944e-38, %v2306_v36  ;;  %vm2305_vm3 = vcmp.eq.f32.partialorder %v2304_v4, 8.507059e+37  ;;  %v2689_v36 = vld [vmem:[%s4495_s10] sm:$0xff] }
 0x684   :  { %v2324_v47 = vmul.f32 %v4277_v24, %v2323_v5  ;;  %v2692_v5 = vld [vmem:[%s4495_s10 + $0x18] sm:$0xff] }
 0x685   :  { %2742 = vmatpush.msra.mxu3 %v2692_v5 }
 0x686   :  { %2998 = vmatmul.msk.f32.vlgmr.msrb.gmra.mxu2 %vm1141_vm7, %v2324_v47  ;;  %v2691_v47 = vld [vmem:[%s4495_s10 + $0x10] sm:$0xff] }
 0x687   :  { %v3191_v51 = vpop.eup %3190  ;;  %2743 = vmatpush.msra.mxu3 %v2691_v47 }
 0x688   :  { %v2296_v30 = vmul.f32 %v3191_v51, %v2192_v10  ;;  %vm2301_vm14 = vweird.f32 %v3191_v51 }
 0x689   :  { %vm2302_vm2 = vmor %vm2300_vm15, %vm2301_vm14 }
 0x68a   :  { %v2297_v11 = vsub.f32 1.0, %v2296_v30 }
 0x68c   :  { %v2298_v20 = vmul.f32 %v3191_v51, %v2297_v11 }
 0x68e   :  { %v2299_v31 = vadd.f32 %v3191_v51, %v2298_v20 }
 0x690   :  { %v2303_v16 = vsel %vm2302_vm2, %v3191_v51, %v2299_v31  ;;  %v2690_v51 = vld [vmem:[%s4495_s10 + $0x8] sm:$0xff] }
 0x691   :  { %v2308_v9 = vsel %vm2305_vm3, %v2307_v15, %v2303_v16  ;;  %2744 = vmatpush.msra.mxu3 %v2690_v51 }
 0x692   :  { %v2309_v12 = vmul.f32 %v4282_v57, %v2308_v9 }
 0x693   :  { %2745 = vmatpush.msra.mxu3 %v2689_v36 }
 0x694   :  { %2997 = vmatmul.msk.f32.vlgmr.msrb.gmra.mxu0 %vm1141_vm7, %v2309_v12 }
 0x6c8   :  { %v2198_v24 = vpop.xlane.xlu2 %2197 }
 0x6c9   :  { %3192 = vrcp.f32 %v2198_v24  ;;  %v2336_v34 = vand.u32 2147483648, %v2198_v24  ;;  %v2334_v45 = vand.u32 2147483647, %v2198_v24  ;;  %vm2330_vm5 = vweird.f32 %v2198_v24 }
 0x6cb   :  { %v2391_v49 = vpop.f32.mrf.mxu0  ;;  %v2337_v57 = vor.u32 1.1754944e-38, %v2336_v34  ;;  %vm2335_vm9 = vcmp.eq.f32.partialorder %v2334_v45, 8.507059e+37 }
 0x6cc   :  { %2645 = vrot.lane.b32.xlu2 %v2391_v49, %s3340_s11 }
 0x6cf   :  { %v3193_v63 = vpop.eup %3192 }
 0x6d0   :  { %v2326_v38 = vmul.f32 %v3193_v63, %v2198_v24  ;;  %v2204_v60 = vpop.xlane.xlu0 %2203  ;;  %vm2331_vm4 = vweird.f32 %v3193_v63 }
 0x6d1   :  { %3194 = vrcp.f32 %v2204_v60  ;;  %vm2332_vm8 = vmor %vm2330_vm5, %vm2331_vm4  ;;  %v2366_v29 = vand.u32 2147483648, %v2204_v60  ;;  %v2364_v54 = vand.u32 2147483647, %v2204_v60  ;;  %vm2360_vm11 = vweird.f32 %v2204_v60 }
 0x6d2   :  { %v2327_v33 = vsub.f32 1.0, %v2326_v38 }
 0x6d3   :  { %v2367_v62 = vor.u32 1.1754944e-38, %v2366_v29  ;;  %vm2365_vm6 = vcmp.eq.f32.partialorder %v2364_v54, 8.507059e+37 }
 0x6d4   :  { %v2328_v59 = vmul.f32 %v3193_v63, %v2327_v33 }
 0x6d6   :  { %v2329_v14 = vadd.f32 %v3193_v63, %v2328_v59 }
 0x6d7   :  { %v3195_v35 = vpop.eup %3194 }
 0x6d8   :  { %v2333_v28 = vsel %vm2332_vm8, %v3193_v63, %v2329_v14  ;;  %v2356_v7 = vmul.f32 %v3195_v35, %v2204_v60  ;;  %vm2361_vm10 = vweird.f32 %v3195_v35 }
 0x6d9   :  { %v2338_v53 = vsel %vm2335_vm9, %v2337_v57, %v2333_v28  ;;  %vm2362_vm12 = vmor %vm2360_vm11, %vm2361_vm10 }
 0x6da   :  { %v2339_v48 = vmul.f32 %v4291_v0, %v2338_v53  ;;  %v2357_v50 = vsub.f32 1.0, %v2356_v7 }
 0x6dc   :  { %2999 = vmatmul.msk.f32.vlgmr.msrb.gmra.mxu3 %vm1141_vm7, %v2339_v48  ;;  %v2358_v52 = vmul.f32 %v3195_v35, %v2357_v50 }
 0x6de   :  { %v2359_v18 = vadd.f32 %v3195_v35, %v2358_v52 }
 0x6e0   :  { %v2201_v19 = vpop.xlane.xlu1 %2200  ;;  %v2363_v42 = vsel %vm2362_vm12, %v3195_v35, %v2359_v18 }
 0x6e1   :  { %3196 = vrcp.f32 %v2201_v19  ;;  %v2368_v56 = vsel %vm2365_vm6, %v2367_v62, %v2363_v42  ;;  %v2351_v25 = vand.u32 2147483648, %v2201_v19  ;;  %v2349_v21 = vand.u32 2147483647, %v2201_v19 }
 0x6e2   :  { %v2369_v17 = vmul.f32 %v4295_v43, %v2368_v56  ;;  %vm2345_vm14 = vweird.f32 %v2201_v19 }
 0x6e3   :  { %v2352_v32 = vor.u32 1.1754944e-38, %v2351_v25  ;;  %vm2350_vm2 = vcmp.eq.f32.partialorder %v2349_v21, 8.507059e+37  ;;  %v3201_v21 = vld [vmem:[%s4485_s0 + $0x28] sm:$0xff] }
 0x6e4   :  { %3001 = vmatmul.msk.f32.vlgmr.msra.gmra.mxu2 %vm1141_vm7, %v2369_v17 }
 0x6e7   :  { %v3197_v0 = vpop.eup %3196  ;;  %v2415_v37 = vpop.f32.mrf.mxu2 }
 0x6e8   :  { %v2341_v13 = vmul.f32 %v3197_v0, %v2201_v19  ;;  %2647 = vrot.lane.b32.xlu1 %v2415_v37, %s3340_s11  ;;  %vm2346_vm13 = vweird.f32 %v3197_v0  ;;  %v3199_v19 = vld [vmem:[%s4485_s0 + $0x18] sm:$0xff]  ;;  %v3200_v37 = vld [vmem:[%s4485_s0 + $0x20] sm:$0xff] }
 0x6e9   :  { %vm2347_vm15 = vmor %vm2345_vm14, %vm2346_vm13 }
 0x6ea   :  { %v2342_v61 = vsub.f32 1.0, %v2341_v13 }
 0x6ec   :  { %v2343_v39 = vmul.f32 %v3197_v0, %v2342_v61 }
 0x6ee   :  { %v2344_v26 = vadd.f32 %v3197_v0, %v2343_v39 }
 0x6ef   :  { %v2439_v41 = vpop.f32.mrf.mxu3 }
 0x6f0   :  { %v2348_v10 = vsel %vm2347_vm15, %v3197_v0, %v2344_v26  ;;  %2649 = vrot.lane.b32.xlu0 %v2439_v41, %s3340_s11 }
 0x6f1   :  { %v2353_v43 = vsel %vm2350_vm2, %v2352_v32, %v2348_v10  ;;  %v2487_v30 = vpop.f32.mrf.mxu2 }
 0x6f2   :  { %v2354_v44 = vmul.f32 %v4303_v22, %v2353_v43 }
 0x6f4   :  { %3000 = vmatmul.msk.f32.vlgmr.msra.gmra.mxu0 %vm1141_vm7, %v2354_v44  ;;  %v3202_v44 = vld [vmem:[%s4485_s0 + $0x30] sm:$0xff] }
 0x6f8   :  { %2653 = vrot.lane.b32.xlu0 %v2487_v30, %s3340_s11 }
 0x6f9   :  { %v2463_v22 = vpop.f32.mrf.mxu0  ;;  %v2511_v11 = vpop.f32.mrf.mxu3 }
 0x6fa   :  { %2651 = vrot.lane.b32.xlu2 %v2463_v22, %s3340_s11  ;;  %2655 = vrot.lane.b32.xlu1 %v2511_v11, %s3340_s11  ;;  %v3203_v11 = vld [vmem:[%s4485_s0 + $0x38] sm:$0xff] }
 0x709   :  { %v2559_v20 = vpop.f32.mrf.mxu2 }
 0x70a   :  { %2659 = vrot.lane.b32.xlu0 %v2559_v20, %s3340_s11 }
 0x711   :  { %v2535_v4 = vpop.f32.mrf.mxu0 }
 0x712   :  { %2657 = vrot.lane.b32.xlu2 %v2535_v4, %s3340_s11 }
 0x726   :  { %v2646_v31 = vpop.permute.xlu2 %2645 }
 0x727   :  { %v2678_v15 = vsel %vm149_vm0, %v4166_v40, %v2646_v31 }
 0x728   :  { %3002 = vmatmul.msk.f32.vlgmr.msra.gmra.mxu3 %vm169_vm1, %v2678_v15 }
 0x754   :  { %v2652_v38 = vpop.permute.xlu2 %2651 }
 0x755   :  { %v2681_v40 = vsel %vm149_vm0, %v4158_v8, %v2652_v38  ;;  %v3205_v38 = vld [vmem:[%s4485_s0 + $0x48] sm:$0xff] }
 0x75a   :  { %v2648_v16 = vpop.permute.xlu1 %2647 }
 0x75b   :  { %v2679_v9 = vsel %vm149_vm0, %v4168_v46, %v2648_v16  ;;  %v3204_v16 = vld [vmem:[%s4485_s0 + $0x40] sm:$0xff] }
 0x75c   :  { %3003 = vmatmul.msk.f32.gmra.mxu3 %vm169_vm1, %v2679_v9 }
 0x75f   :  { %v2583_v12 = vpop.f32.mrf.mxu3 }
 0x760   :  { %2661 = vrot.lane.b32.xlu1 %v2583_v12, %s3340_s11 }
 0x762   :  { %v2650_v24 = vpop.permute.xlu0 %2649 }
 0x763   :  { %v2680_v49 = vsel %vm149_vm0, %v4162_v27, %v2650_v24 }
 0x764   :  { %3004 = vmatmul.msk.f32.gmra.mxu3 %vm169_vm1, %v2680_v49 }
 0x767   :  { %v2631_v63 = vpop.f32.mrf.mxu2 }
 0x768   :  { %2665 = vrot.lane.b32.xlu0 %v2631_v63, %s3340_s11 }
 0x76a   :  { %v2654_v46 = vpop.permute.xlu0 %2653 }
 0x76b   :  { %v2682_v33 = vsel %vm149_vm0, %v4170_v58, %v2654_v46  ;;  %v4375_v58 = vld [vmem:[#allocation7] ss:$0 sm:$0xff] }
 0x76c   :  { %3005 = vmatmul.msk.f32.gmra.mxu3 %vm169_vm1, %v2681_v40  ;;  %v2656_v27 = vpop.permute.xlu1 %2655  ;;  %v2658_v59 = vpop.permute.xlu2 %2657 }
 0x76d   :  { %v2683_v34 = vsel %vm149_vm0, %v4174_v1, %v2656_v27  ;;  %v2684_v8 = vsel %vm149_vm0, %v4164_v2, %v2658_v59  ;;  %v4381_v1 = vld [vmem:[%s4497_s12] ss:$0 sm:$0xff]  ;;  %v3198_v2 = vld [vmem:[%s4485_s0 + $0x10] sm:$0xff] }
 0x771   :  { %v2607_v60 = vpop.f32.mrf.mxu0 }
 0x772   :  { %2663 = vrot.lane.b32.xlu2 %v2607_v60, %s3340_s11 }
 0x774   :  { %3006 = vmatmul.msk.f32.gmra.mxu3 %vm169_vm1, %v2682_v33 }
 0x77c   :  { %3007 = vmatmul.msk.f32.gmra.mxu3 %vm169_vm1, %v2683_v34  ;;  %v2660_v45 = vpop.permute.xlu0 %2659  ;;  %v3206_v34 = vld [vmem:[%s4485_s0 + $0x50] sm:$0xff] }
 0x77d   :  { %v2685_v14 = vsel %vm149_vm0, %v4160_v23, %v2660_v45  ;;  %v4389_v23 = vld [vmem:[%s4498_s13] ss:$0 sm:$0xff] }
 0x784   :  { %3008 = vmatmul.msk.f32.gmra.mxu3 %vm169_vm1, %v2684_v8 }
 0x78c   :  { %3009 = vmatmul.msk.f32.gmra.mxu3 %vm169_vm1, %v2685_v14 }
 0x7ab   :  { %v2747_v57 = vpop.f32.mrf.mxu3 }
 0x7ac   :  { %v2748_v35 = vadd.f32 %v4375_v58, %v2747_v57 }
 0x7ae   :  { %v2780_v28 = vadd.f32 %v3198_v2, %v2748_v35  ;;  %v3207_v35 = vld [vmem:[%s4485_s0 + $0x58] sm:$0xff] }
 0x7b0   :  { %v2795_v53 = vmul.f32 %v4381_v1, %v2780_v28 }
 0x7b2   :  { %v2810_v7 = vadd.f32 %v4389_v23, %v2795_v53 }
 0x7b4   :  { %2821 = vst.msk [vmem:[#allocation8] sm:$0xff] %vm149_vm0, %v2810_v7 }
 0x7cc   :  { %v2664_v29 = vpop.permute.xlu2 %2663 }
 0x7cd   :  { %v2687_v52 = vsel %vm149_vm0, %v4178_v3, %v2664_v29 }
 0x7d2   :  { %v2662_v48 = vpop.permute.xlu1 %2661 }
 0x7d3   :  { %v2686_v50 = vsel %vm149_vm0, %v4176_v6, %v2662_v48 }
 0x7d4   :  { %3010 = vmatmul.msk.f32.gmra.mxu3 %vm169_vm1, %v2686_v50  ;;  %v3208_v50 = vld [vmem:[%s4485_s0 + $0x60] sm:$0xff] }
 0x7da   :  { %v2666_v18 = vpop.permute.xlu0 %2665 }
 0x7db   :  { %v2688_v6 = vsel %vm149_vm0, %v4172_v55, %v2666_v18 }
 0x7dc   :  { %3011 = vmatmul.msk.f32.gmra.mxu3 %vm169_vm1, %v2687_v52 }
 0x7df   :  { %v2750_v54 = vpop.f32.mrf.mxu3 }
 0x7e0   :  { %v2751_v62 = vadd.f32 %v4375_v58, %v2750_v54 }
 0x7e2   :  { %v2781_v42 = vadd.f32 %v3199_v19, %v2751_v62 }
 0x7e4   :  { %v2796_v56 = vmul.f32 %v4381_v1, %v2781_v42  ;;  %3012 = vmatmul.msk.f32.gmra.mxu3 %vm169_vm1, %v2688_v6 }
 0x7e6   :  { %v2811_v3 = vadd.f32 %v4389_v23, %v2796_v56 }
 0x7e7   :  { %v2753_v17 = vpop.f32.mrf.mxu3 }
 0x7e8   :  { %2822 = vst.msk [vmem:[#allocation8 + $0x8] sm:$0xff] %vm149_vm0, %v2811_v3  ;;  %v2754_v0 = vadd.f32 %v4375_v58, %v2753_v17 }
 0x7ea   :  { %v2782_v13 = vadd.f32 %v3200_v37, %v2754_v0 }
 0x7ec   :  { %v2797_v61 = vmul.f32 %v4381_v1, %v2782_v13 }
 0x7ee   :  { %v2812_v55 = vadd.f32 %v4389_v23, %v2797_v61 }
 0x7ef   :  { %v2756_v25 = vpop.f32.mrf.mxu3 }
 0x7f0   :  { %2823 = vst.msk [vmem:[#allocation8 + $0x10] sm:$0xff] %vm149_vm0, %v2812_v55  ;;  %v2757_v39 = vadd.f32 %v4375_v58, %v2756_v25 }
 0x7f2   :  { %v2783_v26 = vadd.f32 %v3201_v21, %v2757_v39 }
 0x7f4   :  { %v2798_v32 = vmul.f32 %v4381_v1, %v2783_v26 }
 0x7f6   :  { %v2813_v10 = vadd.f32 %v4389_v23, %v2798_v32 }
 0x7f7   :  { %v2759_v41 = vpop.f32.mrf.mxu3 }
 0x7f8   :  { %2824 = vst.msk [vmem:[#allocation8 + $0x18] sm:$0xff] %vm149_vm0, %v2813_v10  ;;  %v2760_v43 = vadd.f32 %v4375_v58, %v2759_v41 }
 0x7fa   :  { %v2784_v5 = vadd.f32 %v3202_v44, %v2760_v43 }
 0x7fc   :  { %v2799_v47 = vmul.f32 %v4381_v1, %v2784_v5 }
 0x7fe   :  { %v2814_v51 = vadd.f32 %v4389_v23, %v2799_v47 }
 0x7ff   :  { %v2762_v30 = vpop.f32.mrf.mxu3 }
 0x800   :  { %2825 = vst.msk [vmem:[#allocation8 + $0x20] sm:$0xff] %vm149_vm0, %v2814_v51  ;;  %v2763_v22 = vadd.f32 %v4375_v58, %v2762_v30 }
 0x802   :  { %v2785_v36 = vadd.f32 %v3203_v11, %v2763_v22 }
 0x804   :  { %v2800_v20 = vmul.f32 %v4381_v1, %v2785_v36 }
 0x806   :  { %v2815_v4 = vadd.f32 %v4389_v23, %v2800_v20 }
 0x807   :  { %v2765_v31 = vpop.f32.mrf.mxu3 }
 0x808   :  { %2826 = vst.msk [vmem:[#allocation8 + $0x28] sm:$0xff] %vm149_vm0, %v2815_v4  ;;  %v2766_v15 = vadd.f32 %v4375_v58, %v2765_v31 }
 0x80a   :  { %v2786_v9 = vadd.f32 %v3204_v16, %v2766_v15 }
 0x80c   :  { %v2801_v12 = vmul.f32 %v4381_v1, %v2786_v9 }
 0x80e   :  { %v2816_v24 = vadd.f32 %v4389_v23, %v2801_v12 }
 0x80f   :  { %v2768_v49 = vpop.f32.mrf.mxu3 }
 0x810   :  { %2827 = vst.msk [vmem:[#allocation8 + $0x30] sm:$0xff] %vm149_vm0, %v2816_v24  ;;  %v2769_v63 = vadd.f32 %v4375_v58, %v2768_v49 }
 0x812   :  { %v2787_v40 = vadd.f32 %v3205_v38, %v2769_v63 }
 0x814   :  { %v2802_v46 = vmul.f32 %v4381_v1, %v2787_v40 }
 0x816   :  { %v2817_v60 = vadd.f32 %v4389_v23, %v2802_v46 }
 0x818   :  { %2828 = vst.msk [vmem:[#allocation8 + $0x38] sm:$0xff] %vm149_vm0, %v2817_v60 }
 0x857   :  { %v2771_v33 = vpop.f32.mrf.mxu3 }
 0x858   :  { %v2772_v27 = vadd.f32 %v4375_v58, %v2771_v33 }
 0x85a   :  { %v2788_v59 = vadd.f32 %v3206_v34, %v2772_v27 }
 0x85c   :  { %v2803_v8 = vmul.f32 %v4381_v1, %v2788_v59 }
 0x85e   :  { %v2818_v45 = vadd.f32 %v4389_v23, %v2803_v8 }
 0x85f   :  { %v2774_v14 = vpop.f32.mrf.mxu3 }
 0x860   :  { %2829 = vst.msk [vmem:[#allocation8 + $0x40] sm:$0xff] %vm149_vm0, %v2818_v45  ;;  %v2775_v57 = vadd.f32 %v4375_v58, %v2774_v14 }
 0x862   :  { %v2789_v2 = vadd.f32 %v3207_v35, %v2775_v57 }
 0x864   :  { %v2804_v28 = vmul.f32 %v4381_v1, %v2789_v2 }
 0x866   :  { %v2819_v53 = vadd.f32 %v4389_v23, %v2804_v28 }
 0x867   :  { %v2777_v7 = vpop.f32.mrf.mxu3 }
 0x868   :  { %2830 = vst.msk [vmem:[#allocation8 + $0x48] sm:$0xff] %vm149_vm0, %v2819_v53  ;;  %v2778_v48 = vadd.f32 %v4375_v58, %v2777_v7 }
 0x86a   :  { %v2790_v29 = vadd.f32 %v3208_v50, %v2778_v48 }
 0x86c   :  { %v2805_v52 = vmul.f32 %v4381_v1, %v2790_v29 }
 0x86e   :  { %v2820_v54 = vadd.f32 %v4389_v23, %v2805_v52 }
 0x870   :  { %2831 = vst.msk [vmem:[#allocation8 + $0x50] sm:$0xff] %vm149_vm0, %v2820_v54 }
 0x871   :  { %2844 = dma.vmem_to_hbm [thread:$0]  %s2837_s28, 1408, %s2839_s29, [#allocation4], %s3346_s4, %s3346_s4, %s3347_s1  }
 0x872   :  { %3333 = dma.done.wait [#allocation4], 1408  }
 0x873   :  { %3334 = vsyncadd [#allocation4], 4294965888 }
 0x874   :  { %3335 = dma.done.wait [#allocation10], 1408  }
 0x875   :  { %3336 = vsyncadd [#allocation10], 4294965888 }
 0x876   :  { %2866 = vsyncpa [#allocation3], 1 }
 0x877   :  { %2867 = vsyncpa [#allocation6], 1 }
 0x878   :  { %2868 = vsyncpa [#allocation4], 1 }
 0x879   :  { %2869 = vsyncpa [#allocation10], 1 }

</bundles_post_ra>
